<compile_context>
chip_gen: v7x
topology: tpu7x:2x2x1
jax: 0.10.0
libtpu: 0.0.40
codegen_flags: <defaults>
</compile_context>

<pallas_src>
import functools

import numpy as np
import jax
import jax.numpy as jnp
from jax.experimental import pallas as pl
from jax.experimental.pallas import tpu as pltpu


# ----------------------------------------------------------------------------
# config plumbing (faithful port of the PyTorch helpers)
# ----------------------------------------------------------------------------
def blockConfig2Params(config: dict):
    nr_blocks = config['number_blocks']
    if nr_blocks == 1:
        return ([config['parameters']], config['type'])
    config_list = []
    for i in range(nr_blocks):
        new_config = config['parameters'].copy()
        for k, v in zip(config['parameters'].keys(),
                        config['parameters'].values()):
            if type(v) is list:
                if len(v) == nr_blocks:
                    new_config[k] = v[i]
                if k == 'subsampling_ratio':
                    new_config['cum_subsampling_ratio'] = np.cumprod([1.0] + v)[i]
        config_list.append(new_config)
    return (config_list, config['type'])


def getBlocks(config: dict):
    config_it, block_type = blockConfig2Params(config)
    blocks = []
    for c in config_it:
        blocks.append(eval(block_type)(c))
    if len(config_it) == 1:
        return blocks[0]
    return SequentialBlocks(blocks)


# ----------------------------------------------------------------------------
# small helpers
# ----------------------------------------------------------------------------
def _round_up(x, m):
    return ((int(x) + m - 1) // m) * m


def _device_kind():
    try:
        return jax.devices()[0].device_kind.lower()
    except Exception:
        return ""


def _is_multicore_tpu():
    # v7x has 2 TensorCores per chip; v5e/v6e have 1.
    return "v7" in _device_kind()


def _vmem_cap_bytes():
    # Leave headroom under v7x's 64 MiB physical VMEM; v5e/v6e have 128 MiB.
    return (56 << 20) if "v7" in _device_kind() else (100 << 20)


def _choose_tile(n, multi_core):
    """Row tile: single grid step for small N; 16-aligned (bf16 sublanes);
    even, 128-aligned parallel split for large N on v7x (2 TCs)."""
    max_tile = 1024 if multi_core else 2048
    n16 = _round_up(max(int(n), 1), 16)
    if n16 <= max_tile:
        return n16                       # one grid step: no per-step overhead
    steps = -(-n16 // max_tile)
    if multi_core and steps % 2:
        steps += 1                       # even number of parallel steps (2 TCs)
    return _round_up(-(-n16 // steps), 128)


# ----------------------------------------------------------------------------
# Pallas kernel: fused multi-layer Linear (+bias) (+ReLU) over point features
# ----------------------------------------------------------------------------
def _mlp_kernel(*refs, relu_flags):
    """refs = (x_ref, w_0..w_{L-1}, b_0..b_{L-1}, o_ref)

    x_ref : (TILE_N, Cin0_pad)      bf16
    w_l   : (Cin_l_pad, Cout_l_pad) bf16   (per-layer padded, VMEM-resident)
    b_l   : (1, Cout_l_pad)         f32
    o_ref : (TILE_N, Cout_last_pad) f32    (lane-dense; sliced in the wrapper)
    """
    n_layers = len(relu_flags)
    x_ref = refs[0]
    w_refs = refs[1:1 + n_layers]
    b_refs = refs[1 + n_layers:1 + 2 * n_layers]
    o_ref = refs[1 + 2 * n_layers]

    x = x_ref[...]
    acc = None
    for l in range(n_layers):                    # statically unrolled chain
        acc = jnp.dot(x, w_refs[l][...], preferred_element_type=jnp.float32)
        acc = acc + b_refs[l][...]               # f32 bias on f32 accumulator
        if relu_flags[l]:
            acc = jnp.maximum(acc, 0.0)
        if l + 1 < n_layers:
            x = acc.astype(jnp.bfloat16)         # bf16 input for next matmul
    o_ref[...] = acc.astype(o_ref.dtype)


class FusedMLPParams:
    """Per-layer padded, bf16 weight stack prepared ONCE (hoisted out of the
    forward path).  Zero-padded lanes stay inert (zero rows/cols/bias)."""

    def __init__(self, weights, biases, relu_flags):
        if len(weights) == 0:
            raise ValueError("FusedMLPParams requires at least one layer")
        if not (len(weights) == len(biases) == len(relu_flags)):
            raise ValueError("weights / biases / relu_flags length mismatch")
        for l in range(1, len(weights)):
            if weights[l].shape[0] != weights[l - 1].shape[1]:
                raise ValueError("layer channel chain mismatch at layer %d" % l)

        self.relu_flags = tuple(bool(r) for r in relu_flags)
        self.c_in = int(weights[0].shape[0])
        self.c_out = int(weights[-1].shape[1])

        self.w_padded = []
        self.b_padded = []
        for w, b in zip(weights, biases):
            ci, co = int(w.shape[0]), int(w.shape[1])
            ci_p, co_p = _round_up(ci, 128), _round_up(co, 128)
            wp = jnp.pad(w.astype(jnp.bfloat16), ((0, ci_p - ci), (0, co_p - co)))
            bp = jnp.pad(b.astype(jnp.float32).reshape(1, co), ((0, 0), (0, co_p - co)))
            self.w_padded.append(wp)
            self.b_padded.append(bp)

        self.c_in_pad = int(self.w_padded[0].shape[0])
        self.c_out_pad = int(self.w_padded[-1].shape[1])


def fused_mlp_apply(params: FusedMLPParams, x, tile_n=None):
    """Apply the fused MLP to point features x: [N, C_in] f32 -> [N, C_out] f32."""
    N, C_in = x.shape
    if C_in != params.c_in:
        raise ValueError("feature width %d != expected %d" % (C_in, params.c_in))

    multi_core = _is_multicore_tpu()
    if tile_n is None:
        tile_n = _choose_tile(N, multi_core)
    grid = pl.cdiv(N, tile_n)
    n_pad = grid * tile_n

    # per-call activation pad/cast (weights were padded once at init)
    x_p = jnp.pad(x.astype(jnp.bfloat16),
                  ((0, n_pad - N), (0, params.c_in_pad - C_in)))

    n_layers = len(params.relu_flags)
    kernel = functools.partial(_mlp_kernel, relu_flags=params.relu_flags)

    # explicit VMEM budget from the real footprint, clamped per generation
    in_tile_b = tile_n * params.c_in_pad * 2          # bf16, double-buffered
    out_tile_b = tile_n * params.c_out_pad * 4        # f32,  double-buffered
    w_bytes = sum(int(np.prod(w.shape)) * 2 for w in params.w_padded)
    b_bytes = sum(8 * int(bp.shape[1]) * 4 for bp in params.b_padded)
    footprint = 2 * (in_tile_b + out_tile_b) + 2 * (w_bytes + b_bytes)
    vmem_limit = int(min(max(footprint + (16 << 20), 32 << 20), _vmem_cap_bytes()))

    out_shape = jax.ShapeDtypeStruct((n_pad, params.c_out_pad), jnp.float32)

    def _call(single_buffer):
        resident_kwargs = {}
        if single_buffer and hasattr(pl, "Buffered"):
            # constant index_map -> never refetched; single-buffer to halve VMEM
            resident_kwargs = dict(pipeline_mode=pl.Buffered(1))
        in_specs = [pl.BlockSpec((tile_n, params.c_in_pad), lambda i: (i, 0))]
        for wp in params.w_padded:
            in_specs.append(pl.BlockSpec(tuple(wp.shape), lambda i: (0, 0),
                                         **resident_kwargs))
        for bp in params.b_padded:
            in_specs.append(pl.BlockSpec(tuple(bp.shape), lambda i: (0, 0),
                                         **resident_kwargs))
        return pl.pallas_call(
            kernel,
            out_shape=out_shape,
            grid_spec=pltpu.PrefetchScalarGridSpec(
                num_scalar_prefetch=0,
                grid=(grid,),
                in_specs=in_specs,
                out_specs=pl.BlockSpec((tile_n, params.c_out_pad),
                                       lambda i: (i, 0)),
            ),
            compiler_params=pltpu.CompilerParams(
                dimension_semantics=("parallel",),
                vmem_limit_bytes=vmem_limit),
        )(x_p, *params.w_padded, *params.b_padded)

    try:
        out = _call(single_buffer=True)
    except Exception:
        # pipeline_mode / Buffered(1) not supported in this JAX build:
        # fall back to default double-buffering (correct, slightly more VMEM).
        out = _call(single_buffer=False)

    return out[:N, :params.c_out]


# ----------------------------------------------------------------------------
# Blocks
# ----------------------------------------------------------------------------
class LinearBlock:
    """depoco-style linear block: features <- relu(features @ W + b)."""
    # NOTE: class-level counter makes init depend on construction order within
    # the process (reproducibility hazard, not a numerical bug).
    _counter = 0

    def __init__(self, config: dict):
        in_dim = int(config['in_dim'])
        out_dim = int(config['out_dim'])
        self.apply_relu = bool(config.get('relu', True))
        key = jax.random.fold_in(jax.random.PRNGKey(0), LinearBlock._counter)
        LinearBlock._counter += 1
        kw, kb = jax.random.split(key)
        scale = 1.0 / np.sqrt(in_dim)
        self.w = jax.random.uniform(kw, (in_dim, out_dim), jnp.float32,
                                    minval=-scale, maxval=scale)
        self.b = jax.random.uniform(kb, (out_dim,), jnp.float32,
                                    minval=-scale, maxval=scale)
        # hoisted single-layer params for the (rare) non-fused fallback path
        self._fused = FusedMLPParams([self.w], [self.b], [self.apply_relu])

    def __call__(self, input_dict: dict):
        out = dict(input_dict)
        out['features'] = fused_mlp_apply(self._fused, input_dict['features'])
        return out


class SequentialBlocks:
    """Stand-in for nn.Sequential threading a dict through blocks."""

    def __init__(self, blocks):
        self.blocks = list(blocks)

    def __call__(self, input_dict: dict):
        x = input_dict
        for blk in self.blocks:
            x = blk(x)
        return x


class Network:
    def __init__(self, config_list: list):
        blocks = []
        for config in config_list:
            blocks.append(getBlocks(config))
        self.blocks = SequentialBlocks(blocks)

        # Hoist weight padding/stacking out of the forward path: all-Linear
        # networks get one fused, pre-padded parameter set built once here.
        leaves = self._leaf_blocks()
        self._fused = None
        if leaves and all(isinstance(b, LinearBlock) for b in leaves):
            self._fused = FusedMLPParams([b.w for b in leaves],
                                         [b.b for b in leaves],
                                         [b.apply_relu for b in leaves])

    def _leaf_blocks(self):
        leaves = []
        for top in self.blocks.blocks:
            if isinstance(top, SequentialBlocks):
                leaves.extend(top.blocks)
            else:
                leaves.append(top)
        return leaves

    def forward(self, input_dict: dict):
        if self._fused is not None:
            out = dict(input_dict)
            out['features'] = fused_mlp_apply(self._fused,
                                              input_dict['features'])
            return out
        # generic fallback: thread dict through blocks sequentially
        return self.blocks(input_dict)

    __call__ = forward


# ----------------------------------------------------------------------------
# main
# ----------------------------------------------------------------------------
def _reference_mlp(x, leaves):
    ref = x
    for blk in leaves:
        ref = ref @ blk.w + blk.b
        if blk.apply_relu:
            ref = jnp.maximum(ref, 0.0)
    return ref


if __name__ == "__main__":
    IN_DIM = 16           # input feature channels

    config_list = [
        {'type': 'LinearBlock',
         'number_blocks': 2,
         'parameters': {'in_dim': [IN_DIM, 32],
                        'out_dim': [32, 32],
                        'relu': True}},
        {'type': 'LinearBlock',
         'number_blocks': 1,
         'parameters': {'in_dim': 32, 'out_dim': 8, 'relu': False}},
    ]

    net = Network(config_list)
    leaves = net._leaf_blocks()

    key = jax.random.PRNGKey(0)

    # --- test 1: small, non-power-of-two point count (single grid step) ----
    N1 = 300
    k1f, k1p, k2f = jax.random.split(key, 3)
    input_dict = {
        'features': jax.random.normal(k1f, (N1, IN_DIM), jnp.float32),
        'points': jax.random.normal(k1p, (N1, 3), jnp.float32),
    }
    out_dict = net(input_dict)
    feats = jax.block_until_ready(out_dict['features'])

    ref = _reference_mlp(input_dict['features'], leaves)
    assert feats.shape == (N1, 8)
    assert out_dict['points'].shape == (N1, 3)
    assert jnp.allclose(feats, ref, atol=1e-1, rtol=5e-2), (
        float(jnp.max(jnp.abs(feats - ref))))

    # --- test 2: larger point count exercising the multi-step tiled grid ---
    N2 = 2500
    feats2_in = jax.random.normal(k2f, (N2, IN_DIM), jnp.float32)
    out_dict2 = net({'features': feats2_in,
                     'points': jnp.zeros((N2, 3), jnp.float32)})
    feats2 = jax.block_until_ready(out_dict2['features'])
    ref2 = _reference_mlp(feats2_in, leaves)
    assert feats2.shape == (N2, 8)
    assert jnp.allclose(feats2, ref2, atol=1e-1, rtol=5e-2), (
        float(jnp.max(jnp.abs(feats2 - ref2))))

    print("KERNEL_OK")
</pallas_src>

<mosaic_0001>
module attributes {stable_mosaic.version = 11 : i64} {
  func.func @_mlp_kernel(%arg0: i32, %arg1: memref<304x128xbf16, #tpu.memory_space<vmem>>, %arg2: memref<128x128xbf16, #tpu.memory_space<vmem>>, %arg3: memref<128x128xbf16, #tpu.memory_space<vmem>>, %arg4: memref<128x128xbf16, #tpu.memory_space<vmem>>, %arg5: memref<1x128xf32, #tpu.memory_space<vmem>>, %arg6: memref<1x128xf32, #tpu.memory_space<vmem>>, %arg7: memref<1x128xf32, #tpu.memory_space<vmem>>, %arg8: memref<304x128xf32, #tpu.memory_space<vmem>>) attributes {dimension_semantics = [#tpu.dimension_semantics<parallel>], iteration_bounds = array<i64: 1>, scalar_prefetch = 0 : i64, scratch_operands = 0 : i64, tpu.core_type = #tpu.core_type<tc>, window_params = [{transform_indices = @transform_0, window_bounds = array<i64: 304, 128>}, {pipeline_mode = #tpu.pipeline_mode<synchronous>, transform_indices = @transform_1, window_bounds = array<i64: 128, 128>}, {pipeline_mode = #tpu.pipeline_mode<synchronous>, transform_indices = @transform_2, window_bounds = array<i64: 128, 128>}, {pipeline_mode = #tpu.pipeline_mode<synchronous>, transform_indices = @transform_3, window_bounds = array<i64: 128, 128>}, {pipeline_mode = #tpu.pipeline_mode<synchronous>, transform_indices = @transform_4, window_bounds = array<i64: 1, 128>}, {pipeline_mode = #tpu.pipeline_mode<synchronous>, transform_indices = @transform_5, window_bounds = array<i64: 1, 128>}, {pipeline_mode = #tpu.pipeline_mode<synchronous>, transform_indices = @transform_6, window_bounds = array<i64: 1, 128>}, {transform_indices = @transform_7, window_bounds = array<i64: 304, 128>}]} {
    %c0 = arith.constant 0 : index
    %c0_0 = arith.constant 0 : index
    %0 = vector.load %arg1[%c0, %c0_0] : memref<304x128xbf16, #tpu.memory_space<vmem>>, vector<304x128xbf16>
    %c0_1 = arith.constant 0 : index
    %c0_2 = arith.constant 0 : index
    %1 = vector.load %arg2[%c0_1, %c0_2] : memref<128x128xbf16, #tpu.memory_space<vmem>>, vector<128x128xbf16>
    %cst = arith.constant dense<0.000000e+00> : vector<304x128xf32>
    %2 = tpu.matmul %0, %1, %cst {dimension_numbers = #tpu.dot_dimension_numbers<[1], [0], [0], [1], [0, 0, 1, 1], [], []>} : vector<304x128xbf16>, vector<128x128xbf16>, vector<304x128xf32> -> vector<304x128xf32>
    %c0_3 = arith.constant 0 : index
    %c0_4 = arith.constant 0 : index
    %3 = vector.load %arg5[%c0_3, %c0_4] : memref<1x128xf32, #tpu.memory_space<vmem>>, vector<1x128xf32>
    %4 = vector.broadcast %3 : vector<1x128xf32> to vector<304x128xf32>
    %5 = arith.addf %2, %4 : vector<304x128xf32>
    %cst_5 = arith.constant 0.000000e+00 : f32
    %6 = vector.broadcast %cst_5 : f32 to vector<304x128xf32>
    %7 = arith.maximumf %5, %6 : vector<304x128xf32>
    %8 = arith.truncf %7 : vector<304x128xf32> to vector<304x128xbf16>
    %c0_6 = arith.constant 0 : index
    %c0_7 = arith.constant 0 : index
    %9 = vector.load %arg3[%c0_6, %c0_7] : memref<128x128xbf16, #tpu.memory_space<vmem>>, vector<128x128xbf16>
    %cst_8 = arith.constant dense<0.000000e+00> : vector<304x128xf32>
    %10 = tpu.matmul %8, %9, %cst_8 {dimension_numbers = #tpu.dot_dimension_numbers<[1], [0], [0], [1], [0, 0, 1, 1], [], []>} : vector<304x128xbf16>, vector<128x128xbf16>, vector<304x128xf32> -> vector<304x128xf32>
    %c0_9 = arith.constant 0 : index
    %c0_10 = arith.constant 0 : index
    %11 = vector.load %arg6[%c0_9, %c0_10] : memref<1x128xf32, #tpu.memory_space<vmem>>, vector<1x128xf32>
    %12 = vector.broadcast %11 : vector<1x128xf32> to vector<304x128xf32>
    %13 = arith.addf %10, %12 : vector<304x128xf32>
    %cst_11 = arith.constant 0.000000e+00 : f32
    %14 = vector.broadcast %cst_11 : f32 to vector<304x128xf32>
    %15 = arith.maximumf %13, %14 : vector<304x128xf32>
    %16 = arith.truncf %15 : vector<304x128xf32> to vector<304x128xbf16>
    %c0_12 = arith.constant 0 : index
    %c0_13 = arith.constant 0 : index
    %17 = vector.load %arg4[%c0_12, %c0_13] : memref<128x128xbf16, #tpu.memory_space<vmem>>, vector<128x128xbf16>
    %cst_14 = arith.constant dense<0.000000e+00> : vector<304x128xf32>
    %18 = tpu.matmul %16, %17, %cst_14 {dimension_numbers = #tpu.dot_dimension_numbers<[1], [0], [0], [1], [0, 0, 1, 1], [], []>} : vector<304x128xbf16>, vector<128x128xbf16>, vector<304x128xf32> -> vector<304x128xf32>
    %c0_15 = arith.constant 0 : index
    %c0_16 = arith.constant 0 : index
    %19 = vector.load %arg7[%c0_15, %c0_16] : memref<1x128xf32, #tpu.memory_space<vmem>>, vector<1x128xf32>
    %20 = vector.broadcast %19 : vector<1x128xf32> to vector<304x128xf32>
    %21 = arith.addf %18, %20 : vector<304x128xf32>
    %c0_17 = arith.constant 0 : index
    %c0_18 = arith.constant 0 : index
    %22 = vector.load %arg8[%c0_17, %c0_18] : memref<304x128xf32, #tpu.memory_space<vmem>>, vector<304x128xf32>
    tpu.vector_store %arg8[%c0_17, %c0_18], %21 {strides = array<i32>} : memref<304x128xf32, #tpu.memory_space<vmem>>, vector<304x128xf32>,
    return
  }
  func.func @transform_0(%arg0: i32) -> (i32, i32) {
    %c0_i32 = arith.constant 0 : i32
    %c0_i32_0 = arith.constant 0 : i32
    return %arg0, %c0_i32 : i32, i32
  }
  func.func @transform_1(%arg0: i32) -> (i32, i32) {
    %c0_i32 = arith.constant 0 : i32
    %c0_i32_0 = arith.constant 0 : i32
    %c0_i32_1 = arith.constant 0 : i32
    return %c0_i32, %c0_i32_0 : i32, i32
  }
  func.func @transform_2(%arg0: i32) -> (i32, i32) {
    %c0_i32 = arith.constant 0 : i32
    %c0_i32_0 = arith.constant 0 : i32
    %c0_i32_1 = arith.constant 0 : i32
    return %c0_i32, %c0_i32_0 : i32, i32
  }
  func.func @transform_3(%arg0: i32) -> (i32, i32) {
    %c0_i32 = arith.constant 0 : i32
    %c0_i32_0 = arith.constant 0 : i32
    %c0_i32_1 = arith.constant 0 : i32
    return %c0_i32, %c0_i32_0 : i32, i32
  }
  func.func @transform_4(%arg0: i32) -> (i32, i32) {
    %c0_i32 = arith.constant 0 : i32
    %c0_i32_0 = arith.constant 0 : i32
    %c0_i32_1 = arith.constant 0 : i32
    return %c0_i32, %c0_i32_0 : i32, i32
  }
  func.func @transform_5(%arg0: i32) -> (i32, i32) {
    %c0_i32 = arith.constant 0 : i32
    %c0_i32_0 = arith.constant 0 : i32
    %c0_i32_1 = arith.constant 0 : i32
    return %c0_i32, %c0_i32_0 : i32, i32
  }
  func.func @transform_6(%arg0: i32) -> (i32, i32) {
    %c0_i32 = arith.constant 0 : i32
    %c0_i32_0 = arith.constant 0 : i32
    %c0_i32_1 = arith.constant 0 : i32
    return %c0_i32, %c0_i32_0 : i32, i32
  }
  func.func @transform_7(%arg0: i32) -> (i32, i32) {
    %c0_i32 = arith.constant 0 : i32
    %c0_i32_0 = arith.constant 0 : i32
    return %arg0, %c0_i32 : i32, i32
  }
}

module attributes {stable_mosaic.version = 11 : i64} {
  func.func @_mlp_kernel(%arg0: i32, %arg1: memref<304x128xbf16, #tpu.memory_space<vmem>>, %arg2: memref<128x128xbf16, #tpu.memory_space<vmem>>, %arg3: memref<128x128xbf16, #tpu.memory_space<vmem>>, %arg4: memref<128x128xbf16, #tpu.memory_space<vmem>>, %arg5: memref<1x128xf32, #tpu.memory_space<vmem>>, %arg6: memref<1x128xf32, #tpu.memory_space<vmem>>, %arg7: memref<1x128xf32, #tpu.memory_space<vmem>>, %arg8: memref<304x128xf32, #tpu.memory_space<vmem>>) attributes {dimension_semantics = [#tpu.dimension_semantics<parallel>], iteration_bounds = array<i64: 1>, scalar_prefetch = 0 : i64, scratch_operands = 0 : i64, tpu.core_type = #tpu.core_type<tc>, window_params = [{transform_indices = @transform_0, window_bounds = array<i64: 304, 128>}, {pipeline_mode = #tpu.pipeline_mode<synchronous>, transform_indices = @transform_1, window_bounds = array<i64: 128, 128>}, {pipeline_mode = #tpu.pipeline_mode<synchronous>, transform_indices = @transform_2, window_bounds = array<i64: 128, 128>}, {pipeline_mode = #tpu.pipeline_mode<synchronous>, transform_indices = @transform_3, window_bounds = array<i64: 128, 128>}, {pipeline_mode = #tpu.pipeline_mode<synchronous>, transform_indices = @transform_4, window_bounds = array<i64: 1, 128>}, {pipeline_mode = #tpu.pipeline_mode<synchronous>, transform_indices = @transform_5, window_bounds = array<i64: 1, 128>}, {pipeline_mode = #tpu.pipeline_mode<synchronous>, transform_indices = @transform_6, window_bounds = array<i64: 1, 128>}, {transform_indices = @transform_7, window_bounds = array<i64: 304, 128>}]} {
    %c0 = arith.constant 0 : index
    %c0_0 = arith.constant 0 : index
    %0 = vector.load %arg1[%c0, %c0_0] : memref<304x128xbf16, #tpu.memory_space<vmem>>, vector<304x128xbf16>
    %c0_1 = arith.constant 0 : index
    %c0_2 = arith.constant 0 : index
    %1 = vector.load %arg2[%c0_1, %c0_2] : memref<128x128xbf16, #tpu.memory_space<vmem>>, vector<128x128xbf16>
    %cst = arith.constant dense<0.000000e+00> : vector<304x128xf32>
    %2 = tpu.matmul %0, %1, %cst {dimension_numbers = #tpu.dot_dimension_numbers<[1], [0], [0], [1], [0, 0, 1, 1], [], []>} : vector<304x128xbf16>, vector<128x128xbf16>, vector<304x128xf32> -> vector<304x128xf32>
    %c0_3 = arith.constant 0 : index
    %c0_4 = arith.constant 0 : index
    %3 = vector.load %arg5[%c0_3, %c0_4] : memref<1x128xf32, #tpu.memory_space<vmem>>, vector<1x128xf32>
    %4 = vector.broadcast %3 : vector<1x128xf32> to vector<304x128xf32>
    %5 = arith.addf %2, %4 : vector<304x128xf32>
    %cst_5 = arith.constant 0.000000e+00 : f32
    %6 = vector.broadcast %cst_5 : f32 to vector<304x128xf32>
    %7 = arith.maximumf %5, %6 : vector<304x128xf32>
    %8 = arith.truncf %7 : vector<304x128xf32> to vector<304x128xbf16>
    %c0_6 = arith.constant 0 : index
    %c0_7 = arith.constant 0 : index
    %9 = vector.load %arg3[%c0_6, %c0_7] : memref<128x128xbf16, #tpu.memory_space<vmem>>, vector<128x128xbf16>
    %cst_8 = arith.constant dense<0.000000e+00> : vector<304x128xf32>
    %10 = tpu.matmul %8, %9, %cst_8 {dimension_numbers = #tpu.dot_dimension_numbers<[1], [0], [0], [1], [0, 0, 1, 1], [], []>} : vector<304x128xbf16>, vector<128x128xbf16>, vector<304x128xf32> -> vector<304x128xf32>
    %c0_9 = arith.constant 0 : index
    %c0_10 = arith.constant 0 : index
    %11 = vector.load %arg6[%c0_9, %c0_10] : memref<1x128xf32, #tpu.memory_space<vmem>>, vector<1x128xf32>
    %12 = vector.broadcast %11 : vector<1x128xf32> to vector<304x128xf32>
    %13 = arith.addf %10, %12 : vector<304x128xf32>
    %cst_11 = arith.constant 0.000000e+00 : f32
    %14 = vector.broadcast %cst_11 : f32 to vector<304x128xf32>
    %15 = arith.maximumf %13, %14 : vector<304x128xf32>
    %16 = arith.truncf %15 : vector<304x128xf32> to vector<304x128xbf16>
    %c0_12 = arith.constant 0 : index
    %c0_13 = arith.constant 0 : index
    %17 = vector.load %arg4[%c0_12, %c0_13] : memref<128x128xbf16, #tpu.memory_space<vmem>>, vector<128x128xbf16>
    %cst_14 = arith.constant dense<0.000000e+00> : vector<304x128xf32>
    %18 = tpu.matmul %16, %17, %cst_14 {dimension_numbers = #tpu.dot_dimension_numbers<[1], [0], [0], [1], [0, 0, 1, 1], [], []>} : vector<304x128xbf16>, vector<128x128xbf16>, vector<304x128xf32> -> vector<304x128xf32>
    %c0_15 = arith.constant 0 : index
    %c0_16 = arith.constant 0 : index
    %19 = vector.load %arg7[%c0_15, %c0_16] : memref<1x128xf32, #tpu.memory_space<vmem>>, vector<1x128xf32>
    %20 = vector.broadcast %19 : vector<1x128xf32> to vector<304x128xf32>
    %21 = arith.addf %18, %20 : vector<304x128xf32>
    %c0_17 = arith.constant 0 : index
    %c0_18 = arith.constant 0 : index
    %22 = vector.load %arg8[%c0_17, %c0_18] : memref<304x128xf32, #tpu.memory_space<vmem>>, vector<304x128xf32>
    tpu.vector_store %arg8[%c0_17, %c0_18], %21 {strides = array<i32>} : memref<304x128xf32, #tpu.memory_space<vmem>>, vector<304x128xf32>,
    return
  }
  func.func @transform_0(%arg0: i32) -> (i32, i32) {
    %c0_i32 = arith.constant 0 : i32
    %c0_i32_0 = arith.constant 0 : i32
    return %arg0, %c0_i32 : i32, i32
  }
  func.func @transform_1(%arg0: i32) -> (i32, i32) {
    %c0_i32 = arith.constant 0 : i32
    %c0_i32_0 = arith.constant 0 : i32
    %c0_i32_1 = arith.constant 0 : i32
    return %c0_i32, %c0_i32_0 : i32, i32
  }
  func.func @transform_2(%arg0: i32) -> (i32, i32) {
    %c0_i32 = arith.constant 0 : i32
    %c0_i32_0 = arith.constant 0 : i32
    %c0_i32_1 = arith.constant 0 : i32
    return %c0_i32, %c0_i32_0 : i32, i32
  }
  func.func @transform_3(%arg0: i32) -> (i32, i32) {
    %c0_i32 = arith.constant 0 : i32
    %c0_i32_0 = arith.constant 0 : i32
    %c0_i32_1 = arith.constant 0 : i32
    return %c0_i32, %c0_i32_0 : i32, i32
  }
  func.func @transform_4(%arg0: i32) -> (i32, i32) {
    %c0_i32 = arith.constant 0 : i32
    %c0_i32_0 = arith.constant 0 : i32
    %c0_i32_1 = arith.constant 0 : i32
    return %c0_i32, %c0_i32_0 : i32, i32
  }
  func.func @transform_5(%arg0: i32) -> (i32, i32) {
    %c0_i32 = arith.constant 0 : i32
    %c0_i32_0 = arith.constant 0 : i32
    %c0_i32_1 = arith.constant 0 : i32
    return %c0_i32, %c0_i32_0 : i32, i32
  }
  func.func @transform_6(%arg0: i32) -> (i32, i32) {
    %c0_i32 = arith.constant 0 : i32
    %c0_i32_0 = arith.constant 0 : i32
    %c0_i32_1 = arith.constant 0 : i32
    return %c0_i32, %c0_i32_0 : i32, i32
  }
  func.func @transform_7(%arg0: i32) -> (i32, i32) {
    %c0_i32 = arith.constant 0 : i32
    %c0_i32_0 = arith.constant 0 : i32
    return %arg0, %c0_i32 : i32, i32
  }
}

</mosaic_0001>

<bundles_post_ra>
// kernel: tpu_custom_call.1
= control target key start
LH: loop header
LB: loop body
LE: loop exit
PB: predicated region body
PF: predicated region fallthrough
CT: control target
= control target key end

     0   :  { %12 = vsyncpa [#allocation3], 0  ;;  %s2198_s0 = inlined_call_operand.hbm [shape: bf16[304,128], index: 0, kind: input, shape index: {}]   ;;  %s2199_s1 = inlined_call_operand.hbm [shape: bf16[128,128], index: 1, kind: input, shape index: {}]   ;;  %s2200_s2 = inlined_call_operand.hbm [shape: bf16[128,128], index: 2, kind: input, shape index: {}]   ;;  %s2201_s3 = inlined_call_operand.hbm [shape: bf16[128,128], index: 3, kind: input, shape index: {}]   ;;  %s2202_s4 = inlined_call_operand.vmem [shape: f32[1,128], index: 4, kind: input, shape index: {}]   ;;  %s2203_s5 = inlined_call_operand.vmem [shape: f32[1,128], index: 5, kind: input, shape index: {}]   ;;  %s2204_s6 = inlined_call_operand.vmem [shape: f32[1,128], index: 6, kind: input, shape index: {}]   ;;  %s2205_s7 = inlined_call_operand.hbm [shape: f32[304,128], index: 7, kind: output, shape index: {}]  }
   0x1   :  { %13 = vsyncpa [#allocation6], 0 }
   0x2   :  { %14 = vsyncpa [#allocation9], 0 }
   0x3   :  { %15 = vsyncpa [#allocation4], 0  ;;  %s1765_s24 = smov [#allocation5]   ;;  %s1766_s26 = smov [#allocation2]  }
   0x4   :  { %s33_s25 = sshll.u32 %s1765_s24, 4  ;;  %s21_s27 = sshll.u32 %s1766_s26, 4  ;;  %s34_s25 = int_to_ptr.vmem [resolvable:$true] %s33_s25  ;;  %s1816_s27 = int_to_ptr.vmem [resolvable:$true] %s21_s27 }
   0x5   :  { %s1647_s30 = scalar_lea.hbm %s2199_s1, 1024 }
   0x6   :  { %p1648_p0 = scmp.ne.s32.totalorder %s2199_s1, %s1647_s30  ;;  %p1651_p1 = scmp.lt.u32.totalorder %s1647_s30, %s2199_s1 }
   0x8   :  { %p1653_p2 = pnand %p1651_p1, %p1648_p0 }
   0xa   :  { %1656 = shalt.err (!%p1653_p2)
}
   0xb   :  { %s1657_s12 = scalar_lea.vmem %s34_s25, 1024  ;;  %p1662_p4 = scmp.lt.s32.totalorder %s34_s25, %s34_s25 }
   0xc   :  { %p1658_p3 = scmp.ne.s32.totalorder %s34_s25, %s1657_s12  ;;  %p1663_p5 = scmp.lt.s32.totalorder %s1657_s12, %s1657_s12 }
   0xe   :  { %p1664_p6 = por %p1663_p5, %p1662_p4 }
  0x10   :  { %p1665_p7 = pnand %p1664_p6, %p1658_p3 }
  0x12   :  { %1668 = shalt.err (!%p1665_p7)
}
  0x13   :  { %s1767_s13 = smov 64   ;;  %s1768_s14 = smov 4  }
  0x14   :  { %39 = dma.hbm_to_vmem [thread:$0]  %s2199_s1, 1024, %s34_s25, [#allocation6], %s1767_s13, %s1767_s13, %s1768_s14  }
  0x15   :  { %s1669_s19 = scalar_lea.hbm %s2198_s0, 2432 }
  0x16   :  { %p1670_p8 = scmp.ne.s32.totalorder %s2198_s0, %s1669_s19  ;;  %p1673_p9 = scmp.lt.u32.totalorder %s1669_s19, %s2198_s0 }
  0x18   :  { %p1675_p10 = pnand %p1673_p9, %p1670_p8 }
  0x1a   :  { %1678 = shalt.err (!%p1675_p10)
}
  0x1b   :  { %s1679_s24 = scalar_lea.vmem %s1816_s27, 2432  ;;  %p1684_p12 = scmp.lt.s32.totalorder %s1816_s27, %s1816_s27 }
  0x1c   :  { %p1680_p11 = scmp.ne.s32.totalorder %s1816_s27, %s1679_s24  ;;  %p1685_p13 = scmp.lt.s32.totalorder %s1679_s24, %s1679_s24 }
  0x1e   :  { %p1686_p0 = por %p1685_p13, %p1684_p12 }
  0x20   :  { %p1687_p1 = pnand %p1686_p0, %p1680_p11 }
  0x22   :  { %1690 = shalt.err (!%p1687_p1)
}
  0x23   :  { %27 = dma.hbm_to_vmem [thread:$0]  %s2198_s0, 2432, %s1816_s27, [#allocation3], %s1767_s13, %s1767_s13, %s1768_s14  }
  0x24   :  { %s1769_s26 = smov [#allocation7]   ;;  %s1770_s29 = smov [#allocation8]  }
  0x25   :  { %s45_s28 = sshll.u32 %s1769_s26, 4  ;;  %s57_s30 = sshll.u32 %s1770_s29, 4  ;;  %s46_s28 = int_to_ptr.vmem [resolvable:$true] %s45_s28  ;;  %s1853_s30 = int_to_ptr.vmem [resolvable:$true] %s57_s30 }
  0x26   :  { %s1691_s10 = scalar_lea.hbm %s2200_s2, 1024 }
  0x27   :  { %p1692_p2 = scmp.ne.s32.totalorder %s2200_s2, %s1691_s10  ;;  %p1695_p3 = scmp.lt.u32.totalorder %s1691_s10, %s2200_s2 }
  0x29   :  { %p1697_p4 = pnand %p1695_p3, %p1692_p2 }
  0x2b   :  { %1700 = shalt.err (!%p1697_p4)
}
  0x2c   :  { %s1701_s0 = scalar_lea.vmem %s46_s28, 1024  ;;  %p1706_p6 = scmp.lt.s32.totalorder %s46_s28, %s46_s28 }
  0x2d   :  { %p1702_p5 = scmp.ne.s32.totalorder %s46_s28, %s1701_s0  ;;  %p1707_p7 = scmp.lt.s32.totalorder %s1701_s0, %s1701_s0 }
  0x2f   :  { %p1708_p8 = por %p1707_p7, %p1706_p6 }
  0x31   :  { %p1709_p9 = pnand %p1708_p8, %p1702_p5 }
  0x33   :  { %1712 = shalt.err (!%p1709_p9)
}
  0x34   :  { %51 = dma.hbm_to_vmem [thread:$0]  %s2200_s2, 1024, %s46_s28, [#allocation6], %s1767_s13, %s1767_s13, %s1768_s14  }
  0x35   :  { %s1713_s20 = scalar_lea.hbm %s2201_s3, 1024 }
  0x36   :  { %p1714_p10 = scmp.ne.s32.totalorder %s2201_s3, %s1713_s20  ;;  %p1717_p11 = scmp.lt.u32.totalorder %s1713_s20, %s2201_s3 }
  0x38   :  { %p1719_p12 = pnand %p1717_p11, %p1714_p10 }
  0x3a   :  { %1722 = shalt.err (!%p1719_p12)
}
  0x3b   :  { %s1723_s1 = scalar_lea.vmem %s1853_s30, 1024  ;;  %p1728_p0 = scmp.lt.s32.totalorder %s1853_s30, %s1853_s30 }
  0x3c   :  { %p1724_p13 = scmp.ne.s32.totalorder %s1853_s30, %s1723_s1  ;;  %p1729_p1 = scmp.lt.s32.totalorder %s1723_s1, %s1723_s1 }
  0x3e   :  { %p1730_p2 = por %p1729_p1, %p1728_p0 }
  0x40   :  { %p1731_p3 = pnand %p1730_p2, %p1724_p13 }
  0x42   :  { %1734 = shalt.err (!%p1731_p3)
}
  0x43   :  { %63 = dma.hbm_to_vmem [thread:$0]  %s2201_s3, 1024, %s1853_s30, [#allocation9], %s1767_s13, %s1767_s13, %s1768_s14  }
  0x44   :  { %1757 = dma.done.wait [#allocation3], 2432  }
  0x45   :  { %1758 = vsyncadd [#allocation3], 4294964864 }
  0x46   :  { %1759 = dma.done.wait [#allocation6], 2048  }
  0x47   :  { %1760 = vsyncadd [#allocation6], 4294965248 }
  0x48   :  { %1761 = dma.done.wait [#allocation9], 1024  }
  0x49   :  { %1762 = vsyncadd [#allocation9], 4294966272  ;;  %v1771_v0 = vmov 0.0   ;;  %vm1772_vm0 = vmmov 0   ;;  %v1604_v1 = vld [vmem:[#allocation5] sm:$0xff]   ;;  %v1605_v2 = vld [vmem:[#allocation5 + $0x8] sm:$0xff]  }
  0x4a   :  { %1301 = vmatprep.subr.bf16.mxu0 %v1771_v0  ;;  %1317 = vmatprep.mubr.msk.bf16.mxu0 %vm1772_vm0, %v1771_v0  ;;  %v1606_v3 = vld [vmem:[#allocation5 + $0x10] sm:$0xff]   ;;  %v1607_v4 = vld [vmem:[#allocation5 + $0x18] sm:$0xff]   ;;  %v1608_v5 = vld [vmem:[#allocation5 + $0x20] sm:$0xff]  }
  0x4b   :  { %1577 = vmatprep.subr.bf16.mxu1 %v1771_v0  ;;  %1357 = vmatprep.mubr.msk.bf16.mxu1 %vm1772_vm0, %v1771_v0  ;;  %v1609_v6 = vld [vmem:[#allocation5 + $0x28] sm:$0xff]   ;;  %v1610_v7 = vld [vmem:[#allocation5 + $0x30] sm:$0xff]   ;;  %v1611_v8 = vld [vmem:[#allocation5 + $0x38] sm:$0xff]  }
  0x4c   :  { %1302 = vmatpush3.bf16.msra.mxu0 %v1604_v1  ;;  %1585 = vmatpush3.bf16.msra.mxu1 %v1604_v1  ;;  %v1612_v9 = vld [vmem:[#allocation2] sm:$0xff]   ;;  %v1622_v10 = vld [vmem:[#allocation2 + $0x50] sm:$0xff]   ;;  %v1631_v11 = vld [vmem:[#allocation7] sm:$0xff]  }
  0x4d   :  { %1303 = vmatprep.subr.bf16.mxu0 %v1771_v0  ;;  %1578 = vmatprep.subr.bf16.mxu1 %v1771_v0  ;;  %v1632_v12 = vld [vmem:[#allocation7 + $0x8] sm:$0xff]   ;;  %v1613_v13 = vld [vmem:[#allocation2 + $0x8] sm:$0xff]   ;;  %v1623_v14 = vld [vmem:[#allocation2 + $0x58] sm:$0xff]  }
  0x4e   :  { %v1633_v15 = vld [vmem:[#allocation7 + $0x10] sm:$0xff]   ;;  %v1634_v16 = vld [vmem:[#allocation7 + $0x18] sm:$0xff]   ;;  %v1624_v18 = vld [vmem:[#allocation2 + $0x60] sm:$0xff]  }
  0x4f   :  { %v1614_v17 = vld [vmem:[#allocation2 + $0x10] sm:$0xff]   ;;  %v1635_v19 = vld [vmem:[#allocation7 + $0x20] sm:$0xff]   ;;  %v1636_v20 = vld [vmem:[#allocation7 + $0x28] sm:$0xff]  }
  0x50   :  { %1304 = vmatpush3.bf16.msra.mxu0 %v1605_v2  ;;  %1586 = vmatpush3.bf16.msra.mxu1 %v1605_v2  ;;  %v1615_v21 = vld [vmem:[#allocation2 + $0x18] sm:$0xff]   ;;  %v1625_v22 = vld [vmem:[#allocation2 + $0x68] sm:$0xff]   ;;  %v1616_v24 = vld [vmem:[#allocation2 + $0x20] sm:$0xff]  }
  0x51   :  { %1305 = vmatprep.subr.bf16.mxu0 %v1771_v0  ;;  %1579 = vmatprep.subr.bf16.mxu1 %v1771_v0  ;;  %v1637_v23 = vld [vmem:[#allocation7 + $0x30] sm:$0xff]   ;;  %v1626_v25 = vld [vmem:[#allocation2 + $0x70] sm:$0xff]   ;;  %v1627_v27 = vld [vmem:[#allocation2 + $0x78] sm:$0xff]  }
  0x52   :  { %v1617_v26 = vld [vmem:[#allocation2 + $0x28] sm:$0xff]   ;;  %v1618_v28 = vld [vmem:[#allocation2 + $0x30] sm:$0xff]   ;;  %v1628_v29 = vld [vmem:[#allocation2 + $0x80] sm:$0xff]  }
  0x53   :  { %v1619_v30 = vld [vmem:[#allocation2 + $0x38] sm:$0xff]   ;;  %v1629_v31 = vld [vmem:[#allocation2 + $0x88] sm:$0xff]   ;;  %v1620_v32 = vld [vmem:[#allocation2 + $0x40] sm:$0xff]  }
  0x54   :  { %1306 = vmatpush3.bf16.msra.mxu0 %v1606_v3  ;;  %1587 = vmatpush3.bf16.msra.mxu1 %v1606_v3  ;;  %v1630_v33 = vld [vmem:[#allocation2 + $0x90] sm:$0xff]   ;;  %v1621_v34 = vld [vmem:[#allocation2 + $0x48] sm:$0xff]   ;;  %v1960_v36 = vld [vmem:[%s2202_s4] ss:$0 sm:$0xff] }
  0x55   :  { %1307 = vmatprep.subr.bf16.mxu0 %v1771_v0  ;;  %1580 = vmatprep.subr.bf16.mxu1 %v1771_v0  ;;  %v1638_v35 = vld [vmem:[#allocation7 + $0x38] sm:$0xff]  }
  0x58   :  { %1308 = vmatpush3.bf16.msra.mxu0 %v1607_v4  ;;  %1588 = vmatpush3.bf16.msra.mxu1 %v1607_v4 }
  0x59   :  { %1309 = vmatprep.subr.bf16.mxu0 %v1771_v0  ;;  %1581 = vmatprep.subr.bf16.mxu1 %v1771_v0 }
  0x5c   :  { %1310 = vmatpush3.bf16.msra.mxu0 %v1608_v5  ;;  %1589 = vmatpush3.bf16.msra.mxu1 %v1608_v5 }
  0x5d   :  { %1311 = vmatprep.subr.bf16.mxu0 %v1771_v0  ;;  %1582 = vmatprep.subr.bf16.mxu1 %v1771_v0 }
  0x60   :  { %1312 = vmatpush3.bf16.msra.mxu0 %v1609_v6  ;;  %1590 = vmatpush3.bf16.msra.mxu1 %v1609_v6 }
  0x61   :  { %1313 = vmatprep.subr.bf16.mxu0 %v1771_v0  ;;  %1583 = vmatprep.subr.bf16.mxu1 %v1771_v0 }
  0x64   :  { %1314 = vmatpush3.bf16.msra.mxu0 %v1610_v7  ;;  %1591 = vmatpush3.bf16.msra.mxu1 %v1610_v7 }
  0x65   :  { %1315 = vmatprep.subr.bf16.mxu0 %v1771_v0  ;;  %1584 = vmatprep.subr.bf16.mxu1 %v1771_v0 }
  0x68   :  { %1316 = vmatpush3.bf16.msra.mxu0 %v1611_v8  ;;  %1592 = vmatpush3.bf16.msra.mxu1 %v1611_v8 }
  0x69   :  { %1393 = vmatprep.subr.bf16.mxu1 %v1771_v0  ;;  %1485 = vmatprep.subr.bf16.mxu0 %v1771_v0 }
  0x6b   :  { %1318 = vmatmul.mubr.bf16.vlgmr.msra.gmra.mrb[0].mxu0 %v1612_v9  ;;  %1358 = vmatmul.mubr.bf16.vlgmr.msra.gmra.mrb[0].mxu1 %v1622_v10 }
  0x6c   :  { %1321 = vmatprep.mubr.msk.bf16.mxu0 %vm1772_vm0, %v1771_v0  ;;  %1361 = vmatprep.mubr.msk.bf16.mxu1 %vm1772_vm0, %v1771_v0 }
  0x6d   :  { %1394 = vmatpush3.bf16.msra.mxu1 %v1631_v11 }
  0x6e   :  { %1395 = vmatprep.subr.bf16.mxu1 %v1771_v0 }
  0x71   :  { %1396 = vmatpush3.bf16.msra.mxu1 %v1632_v12 }
  0x72   :  { %1397 = vmatprep.subr.bf16.mxu1 %v1771_v0 }
  0x73   :  { %1322 = vmatmul.mubr.bf16.gmra.mrb[4].mxu0 %v1613_v13  ;;  %1362 = vmatmul.mubr.bf16.gmra.mrb[4].mxu1 %v1623_v14 }
  0x74   :  { %1325 = vmatprep.mubr.msk.bf16.mxu0 %vm1772_vm0, %v1771_v0  ;;  %1365 = vmatprep.mubr.msk.bf16.mxu1 %vm1772_vm0, %v1771_v0 }
  0x75   :  { %1398 = vmatpush3.bf16.msra.mxu1 %v1633_v15 }
  0x76   :  { %1399 = vmatprep.subr.bf16.mxu1 %v1771_v0 }
  0x79   :  { %1400 = vmatpush3.bf16.msra.mxu1 %v1634_v16  ;;  %v1639_v16 = vld [vmem:[#allocation8] sm:$0xff]  }
  0x7a   :  { %1401 = vmatprep.subr.bf16.mxu1 %v1771_v0  ;;  %1486 = vmatpush3.bf16.msra.mxu0 %v1639_v16 }
  0x7b   :  { %1326 = vmatmul.mubr.bf16.gmra.mrb[8].mxu0 %v1614_v17  ;;  %1366 = vmatmul.mubr.bf16.gmra.mrb[8].mxu1 %v1624_v18 }
  0x7c   :  { %1329 = vmatprep.mubr.msk.bf16.mxu0 %vm1772_vm0, %v1771_v0  ;;  %1369 = vmatprep.mubr.msk.bf16.mxu1 %vm1772_vm0, %v1771_v0 }
  0x7d   :  { %1402 = vmatpush3.bf16.msra.mxu1 %v1635_v19  ;;  %1487 = vmatprep.subr.bf16.mxu0 %v1771_v0 }
  0x7e   :  { %1403 = vmatprep.subr.bf16.mxu1 %v1771_v0 }
  0x81   :  { %1404 = vmatpush3.bf16.msra.mxu1 %v1636_v20 }
  0x82   :  { %1405 = vmatprep.subr.bf16.mxu1 %v1771_v0 }
  0x83   :  { %1330 = vmatmul.mubr.bf16.gmra.mrb[12].mxu0 %v1615_v21  ;;  %1370 = vmatmul.mubr.bf16.gmra.mrb[12].mxu1 %v1625_v22 }
  0x84   :  { %1333 = vmatprep.mubr.msk.bf16.mxu0 %vm1772_vm0, %v1771_v0  ;;  %1373 = vmatprep.mubr.msk.bf16.mxu1 %vm1772_vm0, %v1771_v0 }
  0x85   :  { %1406 = vmatpush3.bf16.msra.mxu1 %v1637_v23 }
  0x86   :  { %1407 = vmatprep.subr.bf16.mxu1 %v1771_v0 }
  0x89   :  { %1408 = vmatpush3.bf16.msra.mxu1 %v1638_v35  ;;  %v1640_v35 = vld [vmem:[#allocation8 + $0x8] sm:$0xff]  }
  0x8a   :  { %1488 = vmatpush3.bf16.msra.mxu0 %v1640_v35 }
  0x8b   :  { %1334 = vmatmul.mubr.bf16.gmra.mrb[16].mxu0 %v1616_v24  ;;  %1374 = vmatmul.mubr.bf16.gmra.mrb[16].mxu1 %v1626_v25 }
  0x8c   :  { %1337 = vmatprep.mubr.msk.bf16.mxu0 %vm1772_vm0, %v1771_v0  ;;  %1377 = vmatprep.mubr.msk.bf16.mxu1 %vm1772_vm0, %v1771_v0 }
  0x8d   :  { %1489 = vmatprep.subr.bf16.mxu0 %v1771_v0 }
  0x93   :  { %1338 = vmatmul.mubr.bf16.gmra.mrb[20].mxu0 %v1617_v26  ;;  %1378 = vmatmul.mubr.bf16.gmra.mrb[20].mxu1 %v1627_v27 }
  0x94   :  { %1341 = vmatprep.mubr.msk.bf16.mxu0 %vm1772_vm0, %v1771_v0  ;;  %1381 = vmatprep.mubr.msk.bf16.mxu1 %vm1772_vm0, %v1771_v0 }
  0x9b   :  { %1342 = vmatmul.mubr.bf16.gmra.mrb[24].mxu0 %v1618_v28  ;;  %1382 = vmatmul.mubr.bf16.gmra.mrb[24].mxu1 %v1628_v29 }
  0x9c   :  { %1345 = vmatprep.mubr.msk.bf16.mxu0 %vm1772_vm0, %v1771_v0  ;;  %1385 = vmatprep.mubr.msk.bf16.mxu1 %vm1772_vm0, %v1771_v0 }
  0xa3   :  { %1346 = vmatmul.mubr.bf16.gmra.mrb[28].mxu0 %v1619_v30  ;;  %1386 = vmatmul.mubr.bf16.gmra.mrb[28].mxu1 %v1629_v31 }
  0xa4   :  { %1349 = vmatprep.mubr.msk.bf16.mxu0 %vm1772_vm0, %v1771_v0  ;;  %1389 = vmatprep.mubr.msk.bf16.mxu1 %vm1772_vm0, %v1771_v0 }
  0xab   :  { %1350 = vmatmul.mubr.bf16.gmra.mrb[32].mxu0 %v1620_v32  ;;  %1390 = vmatmul.mubr.bf16.gmra.mrb[32].mxu1 %v1630_v33 }
  0xac   :  { %1353 = vmatprep.mubr.msk.bf16.mxu0 %vm1772_vm0, %v1771_v0  ;;  %1409 = vmatprep.mubr.msk.bf16.mxu1 %vm1772_vm0, %v1771_v0 }
  0xb3   :  { %1354 = vmatmul.mubr.bf16.gmra.mrb[36].mxu0 %v1621_v34 }
  0xb4   :  { %1501 = vmatprep.mubr.msk.bf16.mxu0 %vm1772_vm0, %v1771_v0 }
 0x13e   :  { %v340_v37 = vpop.f32.mrb[0].mxu0  ;;  %v420_v38 = vpop.f32.mrb[0].mxu1 }
 0x13f   :  { %v341_v39 = vadd.f32 %v1960_v36, %v340_v37  ;;  %v1319_v40 = vpop.f32.mrb[1].mxu0  ;;  %v421_v41 = vadd.f32 %v1960_v36, %v420_v38  ;;  %v1359_v42 = vpop.f32.mrb[1].mxu1 }
 0x140   :  { %v343_v43 = vpop.f32.mrb[2].mxu0  ;;  %v423_v44 = vpop.f32.mrb[2].mxu1 }
 0x141   :  { %v344_v45 = vadd.f32 %v1960_v36, %v343_v43  ;;  %v1320_v46 = vpop.f32.mrb[3].mxu0  ;;  %v511_v47 = vmax.f32 %v421_v41, 0.0  ;;  %v424_v48 = vadd.f32 %v1960_v36, %v423_v44  ;;  %v1360_v49 = vpop.f32.mrb[3].mxu1  ;;  %v491_v50 = vmax.f32 %v341_v39, 0.0  ;;  %v1641_v44 = vld [vmem:[#allocation8 + $0x10] sm:$0xff]  }
 0x142   :  { %1490 = vmatpush3.bf16.msra.mxu0 %v1641_v44 }
 0x143   :  { %v492_v51 = vmax.f32 %v344_v45, 0.0  ;;  %v512_v52 = vmax.f32 %v424_v48, 0.0  ;;  %1491 = vmatprep.subr.bf16.mxu0 %v1771_v0 }
 0x145   :  { %v529_v53 = vpack.c.bf16 %v492_v51, %v491_v50  ;;  %v1966_v54 = vpack.c.bf16 %v512_v52, %v511_v47  ;;  %v1642_v50 = vld [vmem:[#allocation8 + $0x18] sm:$0xff]  }
 0x146   :  { %v348_v55 = vpop.f32.mrb[4].mxu0  ;;  %v428_v56 = vpop.f32.mrb[4].mxu1  ;;  %1492 = vmatpush3.bf16.msra.mxu0 %v1642_v50 }
 0x147   :  { %v349_v57 = vadd.f32 %v1960_v36, %v348_v55  ;;  %v1323_v58 = vpop.f32.mrb[5].mxu0  ;;  %1410 = vmatmul.mubr.bf16.vlgmr.msra.gmra.mrb[36].mxu1 %v529_v53  ;;  %v429_v59 = vadd.f32 %v1960_v36, %v428_v56  ;;  %v1363_v60 = vpop.f32.mrb[5].mxu1  ;;  %1493 = vmatprep.subr.bf16.mxu0 %v1771_v0 }
 0x148   :  { %v351_v61 = vpop.f32.mrb[6].mxu0  ;;  %1413 = vmatprep.mubr.msk.bf16.mxu1 %vm1772_vm0, %v1771_v0  ;;  %v431_v62 = vpop.f32.mrb[6].mxu1 }
 0x149   :  { %v352_v63 = vadd.f32 %v1960_v36, %v351_v61  ;;  %v1324_v1 = vpop.f32.mrb[7].mxu0  ;;  %v513_v2 = vmax.f32 %v429_v59, 0.0  ;;  %v432_v3 = vadd.f32 %v1960_v36, %v431_v62  ;;  %v1364_v4 = vpop.f32.mrb[7].mxu1  ;;  %v493_v5 = vmax.f32 %v349_v57, 0.0 }
 0x14b   :  { %v494_v6 = vmax.f32 %v352_v63, 0.0  ;;  %v514_v7 = vmax.f32 %v432_v3, 0.0 }
 0x14d   :  { %v530_v8 = vpack.c.bf16 %v494_v6, %v493_v5  ;;  %v1974_v9 = vpack.c.bf16 %v514_v7, %v513_v2  ;;  %v1643_v2 = vld [vmem:[#allocation8 + $0x20] sm:$0xff]  }
 0x14e   :  { %v356_v10 = vpop.f32.mrb[8].mxu0  ;;  %v436_v11 = vpop.f32.mrb[8].mxu1  ;;  %1494 = vmatpush3.bf16.msra.mxu0 %v1643_v2 }
 0x14f   :  { %v357_v12 = vadd.f32 %v1960_v36, %v356_v10  ;;  %v1327_v13 = vpop.f32.mrb[9].mxu0  ;;  %1414 = vmatmul.mubr.bf16.gmra.mrb[40].mxu1 %v530_v8  ;;  %v437_v14 = vadd.f32 %v1960_v36, %v436_v11  ;;  %v1367_v15 = vpop.f32.mrb[9].mxu1  ;;  %v1644_v8 = vld [vmem:[#allocation8 + $0x28] sm:$0xff]   ;;  %1495 = vmatprep.subr.bf16.mxu0 %v1771_v0 }
 0x150   :  { %v359_v17 = vpop.f32.mrb[10].mxu0  ;;  %1417 = vmatprep.mubr.msk.bf16.mxu1 %vm1772_vm0, %v1771_v0  ;;  %v439_v18 = vpop.f32.mrb[10].mxu1 }
 0x151   :  { %v360_v19 = vadd.f32 %v1960_v36, %v359_v17  ;;  %v1328_v20 = vpop.f32.mrb[11].mxu0  ;;  %v515_v21 = vmax.f32 %v437_v14, 0.0  ;;  %v440_v22 = vadd.f32 %v1960_v36, %v439_v18  ;;  %v1368_v23 = vpop.f32.mrb[11].mxu1  ;;  %v495_v24 = vmax.f32 %v357_v12, 0.0 }
 0x152   :  { %1496 = vmatpush3.bf16.msra.mxu0 %v1644_v8  ;;  %v1645_v23 = vld [vmem:[#allocation8 + $0x30] sm:$0xff]  }
 0x153   :  { %v496_v25 = vmax.f32 %v360_v19, 0.0  ;;  %v516_v26 = vmax.f32 %v440_v22, 0.0  ;;  %1497 = vmatprep.subr.bf16.mxu0 %v1771_v0 }
 0x155   :  { %v531_v27 = vpack.c.bf16 %v496_v25, %v495_v24  ;;  %v1983_v28 = vpack.c.bf16 %v516_v26, %v515_v21 }
 0x156   :  { %v364_v29 = vpop.f32.mrb[12].mxu0  ;;  %v444_v30 = vpop.f32.mrb[12].mxu1  ;;  %1498 = vmatpush3.bf16.msra.mxu0 %v1645_v23 }
 0x157   :  { %v365_v31 = vadd.f32 %v1960_v36, %v364_v29  ;;  %v1331_v32 = vpop.f32.mrb[13].mxu0  ;;  %1418 = vmatmul.mubr.bf16.gmra.mrb[44].mxu1 %v531_v27  ;;  %v445_v33 = vadd.f32 %v1960_v36, %v444_v30  ;;  %v1371_v34 = vpop.f32.mrb[13].mxu1  ;;  %v1646_v30 = vld [vmem:[#allocation8 + $0x38] sm:$0xff]   ;;  %1499 = vmatprep.subr.bf16.mxu0 %v1771_v0 }
 0x158   :  { %v367_v37 = vpop.f32.mrb[14].mxu0  ;;  %1421 = vmatprep.mubr.msk.bf16.mxu1 %vm1772_vm0, %v1771_v0  ;;  %v447_v38 = vpop.f32.mrb[14].mxu1 }
 0x159   :  { %v368_v39 = vadd.f32 %v1960_v36, %v367_v37  ;;  %v1332_v40 = vpop.f32.mrb[15].mxu0  ;;  %v517_v41 = vmax.f32 %v445_v33, 0.0  ;;  %v448_v42 = vadd.f32 %v1960_v36, %v447_v38  ;;  %v1372_v43 = vpop.f32.mrb[15].mxu1  ;;  %v497_v45 = vmax.f32 %v365_v31, 0.0 }
 0x15a   :  { %1500 = vmatpush3.bf16.msra.mxu0 %v1646_v30 }
 0x15b   :  { %v498_v46 = vmax.f32 %v368_v39, 0.0  ;;  %v518_v47 = vmax.f32 %v448_v42, 0.0 }
 0x15d   :  { %v532_v48 = vpack.c.bf16 %v498_v46, %v497_v45  ;;  %v1992_v49 = vpack.c.bf16 %v518_v47, %v517_v41 }
 0x15e   :  { %v372_v51 = vpop.f32.mrb[16].mxu0  ;;  %v452_v52 = vpop.f32.mrb[16].mxu1 }
 0x15f   :  { %v373_v53 = vadd.f32 %v1960_v36, %v372_v51  ;;  %v1335_v55 = vpop.f32.mrb[17].mxu0  ;;  %1422 = vmatmul.mubr.bf16.gmra.mrb[48].mxu1 %v532_v48  ;;  %v453_v56 = vadd.f32 %v1960_v36, %v452_v52  ;;  %v1375_v57 = vpop.f32.mrb[17].mxu1 }
 0x160   :  { %v375_v58 = vpop.f32.mrb[18].mxu0  ;;  %1425 = vmatprep.mubr.msk.bf16.mxu1 %vm1772_vm0, %v1771_v0  ;;  %v455_v59 = vpop.f32.mrb[18].mxu1 }
 0x161   :  { %v376_v60 = vadd.f32 %v1960_v36, %v375_v58  ;;  %v1336_v61 = vpop.f32.mrb[19].mxu0  ;;  %v519_v62 = vmax.f32 %v453_v56, 0.0  ;;  %v456_v63 = vadd.f32 %v1960_v36, %v455_v59  ;;  %v1376_v1 = vpop.f32.mrb[19].mxu1  ;;  %v499_v3 = vmax.f32 %v373_v53, 0.0 }
 0x163   :  { %v500_v4 = vmax.f32 %v376_v60, 0.0  ;;  %v520_v5 = vmax.f32 %v456_v63, 0.0 }
 0x165   :  { %v533_v6 = vpack.c.bf16 %v500_v4, %v499_v3  ;;  %v2002_v7 = vpack.c.bf16 %v520_v5, %v519_v62 }
 0x166   :  { %v380_v10 = vpop.f32.mrb[20].mxu0  ;;  %v460_v11 = vpop.f32.mrb[20].mxu1 }
 0x167   :  { %v381_v12 = vadd.f32 %v1960_v36, %v380_v10  ;;  %v1339_v13 = vpop.f32.mrb[21].mxu0  ;;  %1426 = vmatmul.mubr.bf16.gmra.mrb[52].mxu1 %v533_v6  ;;  %v461_v14 = vadd.f32 %v1960_v36, %v460_v11  ;;  %v1379_v15 = vpop.f32.mrb[21].mxu1 }
 0x168   :  { %v383_v16 = vpop.f32.mrb[22].mxu0  ;;  %1429 = vmatprep.mubr.msk.bf16.mxu1 %vm1772_vm0, %v1771_v0  ;;  %v463_v17 = vpop.f32.mrb[22].mxu1 }
 0x169   :  { %v384_v18 = vadd.f32 %v1960_v36, %v383_v16  ;;  %v1340_v19 = vpop.f32.mrb[23].mxu0  ;;  %v521_v20 = vmax.f32 %v461_v14, 0.0  ;;  %v464_v21 = vadd.f32 %v1960_v36, %v463_v17  ;;  %v1380_v22 = vpop.f32.mrb[23].mxu1  ;;  %v501_v24 = vmax.f32 %v381_v12, 0.0 }
 0x16b   :  { %v502_v25 = vmax.f32 %v384_v18, 0.0  ;;  %v522_v26 = vmax.f32 %v464_v21, 0.0 }
 0x16d   :  { %v534_v27 = vpack.c.bf16 %v502_v25, %v501_v24  ;;  %v2012_v29 = vpack.c.bf16 %v522_v26, %v521_v20 }
 0x16e   :  { %v388_v31 = vpop.f32.mrb[24].mxu0  ;;  %v468_v32 = vpop.f32.mrb[24].mxu1 }
 0x16f   :  { %v389_v33 = vadd.f32 %v1960_v36, %v388_v31  ;;  %v1343_v34 = vpop.f32.mrb[25].mxu0  ;;  %1430 = vmatmul.mubr.bf16.gmra.mrb[56].mxu1 %v534_v27  ;;  %v469_v35 = vadd.f32 %v1960_v36, %v468_v32  ;;  %v1383_v37 = vpop.f32.mrb[25].mxu1 }
 0x170   :  { %v391_v38 = vpop.f32.mrb[26].mxu0  ;;  %1433 = vmatprep.mubr.msk.bf16.mxu1 %vm1772_vm0, %v1771_v0  ;;  %v471_v39 = vpop.f32.mrb[26].mxu1 }
 0x171   :  { %v392_v40 = vadd.f32 %v1960_v36, %v391_v38  ;;  %v1344_v41 = vpop.f32.mrb[27].mxu0  ;;  %v523_v42 = vmax.f32 %v469_v35, 0.0  ;;  %v472_v43 = vadd.f32 %v1960_v36, %v471_v39  ;;  %v1384_v44 = vpop.f32.mrb[27].mxu1  ;;  %v503_v45 = vmax.f32 %v389_v33, 0.0 }
 0x173   :  { %v504_v46 = vmax.f32 %v392_v40, 0.0  ;;  %v524_v47 = vmax.f32 %v472_v43, 0.0 }
 0x175   :  { %v535_v48 = vpack.c.bf16 %v504_v46, %v503_v45  ;;  %v2021_v50 = vpack.c.bf16 %v524_v47, %v523_v42 }
 0x176   :  { %v396_v51 = vpop.f32.mrb[28].mxu0  ;;  %v476_v52 = vpop.f32.mrb[28].mxu1 }
 0x177   :  { %v397_v53 = vadd.f32 %v1960_v36, %v396_v51  ;;  %v1347_v55 = vpop.f32.mrb[29].mxu0  ;;  %1434 = vmatmul.mubr.bf16.gmra.mrb[60].mxu1 %v535_v48  ;;  %v477_v56 = vadd.f32 %v1960_v36, %v476_v52  ;;  %v1387_v57 = vpop.f32.mrb[29].mxu1 }
 0x178   :  { %v399_v58 = vpop.f32.mrb[30].mxu0  ;;  %1437 = vmatprep.mubr.msk.bf16.mxu1 %vm1772_vm0, %v1771_v0  ;;  %v479_v59 = vpop.f32.mrb[30].mxu1 }
 0x179   :  { %v400_v60 = vadd.f32 %v1960_v36, %v399_v58  ;;  %v1348_v61 = vpop.f32.mrb[31].mxu0  ;;  %v525_v62 = vmax.f32 %v477_v56, 0.0  ;;  %v480_v63 = vadd.f32 %v1960_v36, %v479_v59  ;;  %v1388_v1 = vpop.f32.mrb[31].mxu1  ;;  %v505_v2 = vmax.f32 %v397_v53, 0.0 }
 0x17b   :  { %v506_v3 = vmax.f32 %v400_v60, 0.0  ;;  %v526_v4 = vmax.f32 %v480_v63, 0.0 }
 0x17d   :  { %v536_v5 = vpack.c.bf16 %v506_v3, %v505_v2  ;;  %v546_v6 = vpack.c.bf16 %v526_v4, %v525_v62 }
 0x17e   :  { %v404_v8 = vpop.f32.mrb[32].mxu0  ;;  %v484_v10 = vpop.f32.mrb[32].mxu1 }
 0x17f   :  { %v405_v11 = vadd.f32 %v1960_v36, %v404_v8  ;;  %v1351_v12 = vpop.f32.mrb[33].mxu0  ;;  %1438 = vmatmul.mubr.bf16.gmra.mrb[64].mxu1 %v536_v5  ;;  %v485_v13 = vadd.f32 %v1960_v36, %v484_v10  ;;  %v1391_v14 = vpop.f32.mrb[33].mxu1 }
 0x180   :  { %v407_v15 = vpop.f32.mrb[34].mxu0  ;;  %1441 = vmatprep.mubr.msk.bf16.mxu1 %vm1772_vm0, %v1771_v0  ;;  %v487_v16 = vpop.f32.mrb[34].mxu1 }
 0x181   :  { %v408_v17 = vadd.f32 %v1960_v36, %v407_v15  ;;  %v1352_v18 = vpop.f32.mrb[35].mxu0  ;;  %v527_v19 = vmax.f32 %v485_v13, 0.0  ;;  %v488_v20 = vadd.f32 %v1960_v36, %v487_v16  ;;  %v1392_v21 = vpop.f32.mrb[35].mxu1  ;;  %v507_v22 = vmax.f32 %v405_v11, 0.0 }
 0x183   :  { %v508_v23 = vmax.f32 %v408_v17, 0.0  ;;  %v528_v24 = vmax.f32 %v488_v20, 0.0 }
 0x185   :  { %v537_v25 = vpack.c.bf16 %v508_v23, %v507_v22  ;;  %v547_v26 = vpack.c.bf16 %v528_v24, %v527_v19 }
 0x186   :  { %v412_v27 = vpop.f32.mrb[36].mxu0 }
 0x187   :  { %v413_v30 = vadd.f32 %v1960_v36, %v412_v27  ;;  %v1355_v31 = vpop.f32.mrb[37].mxu0  ;;  %1442 = vmatmul.mubr.bf16.gmra.mrb[68].mxu1 %v537_v25 }
 0x188   :  { %v415_v32 = vpop.f32.mrb[38].mxu0  ;;  %1445 = vmatprep.mubr.msk.bf16.mxu1 %vm1772_vm0, %v1771_v0 }
 0x189   :  { %v416_v33 = vadd.f32 %v1960_v36, %v415_v32  ;;  %v1356_v34 = vpop.f32.mrb[39].mxu0  ;;  %v509_v35 = vmax.f32 %v413_v30, 0.0  ;;  %v2067_v36 = vld [vmem:[%s2203_s5] ss:$0 sm:$0xff] }
 0x18b   :  { %v510_v37 = vmax.f32 %v416_v33, 0.0 }
 0x18d   :  { %v538_v38 = vpack.c.bf16 %v510_v37, %v509_v35 }
 0x18f   :  { %1446 = vmatmul.mubr.bf16.gmra.mrb[72].mxu1 %v538_v38 }
 0x190   :  { %1449 = vmatprep.mubr.msk.bf16.mxu1 %vm1772_vm0, %v1771_v0 }
 0x197   :  { %1450 = vmatmul.mubr.bf16.gmra.mrb[76].mxu1 %v1966_v54 }
 0x198   :  { %1453 = vmatprep.mubr.msk.bf16.mxu1 %vm1772_vm0, %v1771_v0 }
 0x19f   :  { %1454 = vmatmul.mubr.bf16.gmra.mrb[80].mxu1 %v1974_v9 }
 0x1a0   :  { %1457 = vmatprep.mubr.msk.bf16.mxu1 %vm1772_vm0, %v1771_v0 }
 0x1a7   :  { %1458 = vmatmul.mubr.bf16.gmra.mrb[84].mxu1 %v1983_v28 }
 0x1a8   :  { %1461 = vmatprep.mubr.msk.bf16.mxu1 %vm1772_vm0, %v1771_v0 }
 0x1af   :  { %1462 = vmatmul.mubr.bf16.gmra.mrb[88].mxu1 %v1992_v49 }
 0x1b0   :  { %1465 = vmatprep.mubr.msk.bf16.mxu1 %vm1772_vm0, %v1771_v0 }
 0x1b7   :  { %1466 = vmatmul.mubr.bf16.gmra.mrb[92].mxu1 %v2002_v7 }
 0x1b8   :  { %1469 = vmatprep.mubr.msk.bf16.mxu1 %vm1772_vm0, %v1771_v0 }
 0x1bf   :  { %1470 = vmatmul.mubr.bf16.gmra.mrb[96].mxu1 %v2012_v29 }
 0x1c0   :  { %1473 = vmatprep.mubr.msk.bf16.mxu1 %vm1772_vm0, %v1771_v0 }
 0x1c7   :  { %1474 = vmatmul.mubr.bf16.gmra.mrb[100].mxu1 %v2021_v50 }
 0x1c8   :  { %1477 = vmatprep.mubr.msk.bf16.mxu1 %vm1772_vm0, %v1771_v0 }
 0x1cf   :  { %1478 = vmatmul.mubr.bf16.gmra.mrb[104].mxu1 %v546_v6 }
 0x1d0   :  { %1481 = vmatprep.mubr.msk.bf16.mxu1 %vm1772_vm0, %v1771_v0 }
 0x1d7   :  { %1482 = vmatmul.mubr.bf16.gmra.mrb[108].mxu1 %v547_v26 }
 0x21a   :  { %v653_v54 = vpop.f32.mrb[36].mxu1 }
 0x21b   :  { %v654_v9 = vadd.f32 %v2067_v36, %v653_v54  ;;  %v1411_v28 = vpop.f32.mrb[37].mxu1 }
 0x21c   :  { %v656_v49 = vpop.f32.mrb[38].mxu1 }
 0x21d   :  { %v657_v7 = vadd.f32 %v2067_v36, %v656_v49  ;;  %v1412_v29 = vpop.f32.mrb[39].mxu1  ;;  %v804_v39 = vmax.f32 %v654_v9, 0.0 }
 0x21f   :  { %v805_v40 = vmax.f32 %v657_v7, 0.0 }
 0x221   :  { %v842_v41 = vpack.c.bf16 %v805_v40, %v804_v39 }
 0x222   :  { %v661_v42 = vpop.f32.mrb[40].mxu1 }
 0x223   :  { %v662_v43 = vadd.f32 %v2067_v36, %v661_v42  ;;  %v1415_v44 = vpop.f32.mrb[41].mxu1  ;;  %1502 = vmatmul.mubr.bf16.vlgmr.msra.gmra.mrb[40].mxu0 %v842_v41 }
 0x224   :  { %v664_v45 = vpop.f32.mrb[42].mxu1  ;;  %1505 = vmatprep.mubr.msk.bf16.mxu0 %vm1772_vm0, %v1771_v0 }
 0x225   :  { %v665_v46 = vadd.f32 %v2067_v36, %v664_v45  ;;  %v1416_v47 = vpop.f32.mrb[43].mxu1  ;;  %v806_v48 = vmax.f32 %v662_v43, 0.0 }
 0x227   :  { %v807_v50 = vmax.f32 %v665_v46, 0.0 }
 0x229   :  { %v843_v51 = vpack.c.bf16 %v807_v50, %v806_v48 }
 0x22a   :  { %v669_v52 = vpop.f32.mrb[44].mxu1 }
 0x22b   :  { %v670_v53 = vadd.f32 %v2067_v36, %v669_v52  ;;  %v1419_v55 = vpop.f32.mrb[45].mxu1  ;;  %1506 = vmatmul.mubr.bf16.gmra.mrb[44].mxu0 %v843_v51 }
 0x22c   :  { %v672_v56 = vpop.f32.mrb[46].mxu1  ;;  %1509 = vmatprep.mubr.msk.bf16.mxu0 %vm1772_vm0, %v1771_v0 }
 0x22d   :  { %v673_v57 = vadd.f32 %v2067_v36, %v672_v56  ;;  %v1420_v58 = vpop.f32.mrb[47].mxu1  ;;  %v808_v59 = vmax.f32 %v670_v53, 0.0 }
 0x22f   :  { %v809_v60 = vmax.f32 %v673_v57, 0.0 }
 0x231   :  { %v844_v61 = vpack.c.bf16 %v809_v60, %v808_v59 }
 0x232   :  { %v677_v62 = vpop.f32.mrb[48].mxu1 }
 0x233   :  { %v678_v63 = vadd.f32 %v2067_v36, %v677_v62  ;;  %v1423_v1 = vpop.f32.mrb[49].mxu1  ;;  %1510 = vmatmul.mubr.bf16.gmra.mrb[48].mxu0 %v844_v61 }
 0x234   :  { %v680_v2 = vpop.f32.mrb[50].mxu1  ;;  %1513 = vmatprep.mubr.msk.bf16.mxu0 %vm1772_vm0, %v1771_v0 }
 0x235   :  { %v681_v3 = vadd.f32 %v2067_v36, %v680_v2  ;;  %v1424_v4 = vpop.f32.mrb[51].mxu1  ;;  %v810_v5 = vmax.f32 %v678_v63, 0.0 }
 0x237   :  { %v811_v6 = vmax.f32 %v681_v3, 0.0 }
 0x239   :  { %v845_v8 = vpack.c.bf16 %v811_v6, %v810_v5 }
 0x23a   :  { %v685_v10 = vpop.f32.mrb[52].mxu1 }
 0x23b   :  { %v686_v11 = vadd.f32 %v2067_v36, %v685_v10  ;;  %v1427_v12 = vpop.f32.mrb[53].mxu1  ;;  %1514 = vmatmul.mubr.bf16.gmra.mrb[52].mxu0 %v845_v8 }
 0x23c   :  { %v688_v13 = vpop.f32.mrb[54].mxu1  ;;  %1517 = vmatprep.mubr.msk.bf16.mxu0 %vm1772_vm0, %v1771_v0 }
 0x23d   :  { %v689_v14 = vadd.f32 %v2067_v36, %v688_v13  ;;  %v1428_v15 = vpop.f32.mrb[55].mxu1  ;;  %v812_v16 = vmax.f32 %v686_v11, 0.0 }
 0x23f   :  { %v813_v17 = vmax.f32 %v689_v14, 0.0 }
 0x241   :  { %v846_v18 = vpack.c.bf16 %v813_v17, %v812_v16 }
 0x242   :  { %v693_v19 = vpop.f32.mrb[56].mxu1 }
 0x243   :  { %v694_v20 = vadd.f32 %v2067_v36, %v693_v19  ;;  %v1431_v21 = vpop.f32.mrb[57].mxu1  ;;  %1518 = vmatmul.mubr.bf16.gmra.mrb[56].mxu0 %v846_v18 }
 0x244   :  { %v696_v22 = vpop.f32.mrb[58].mxu1  ;;  %1521 = vmatprep.mubr.msk.bf16.mxu0 %vm1772_vm0, %v1771_v0 }
 0x245   :  { %v697_v23 = vadd.f32 %v2067_v36, %v696_v22  ;;  %v1432_v24 = vpop.f32.mrb[59].mxu1  ;;  %v814_v25 = vmax.f32 %v694_v20, 0.0 }
 0x247   :  { %v815_v26 = vmax.f32 %v697_v23, 0.0 }
 0x249   :  { %v847_v27 = vpack.c.bf16 %v815_v26, %v814_v25 }
 0x24a   :  { %v701_v30 = vpop.f32.mrb[60].mxu1 }
 0x24b   :  { %v702_v31 = vadd.f32 %v2067_v36, %v701_v30  ;;  %v1435_v32 = vpop.f32.mrb[61].mxu1  ;;  %1522 = vmatmul.mubr.bf16.gmra.mrb[60].mxu0 %v847_v27 }
 0x24c   :  { %v704_v33 = vpop.f32.mrb[62].mxu1  ;;  %1525 = vmatprep.mubr.msk.bf16.mxu0 %vm1772_vm0, %v1771_v0 }
 0x24d   :  { %v705_v34 = vadd.f32 %v2067_v36, %v704_v33  ;;  %v1436_v35 = vpop.f32.mrb[63].mxu1  ;;  %v816_v37 = vmax.f32 %v702_v31, 0.0 }
 0x24f   :  { %v817_v38 = vmax.f32 %v705_v34, 0.0 }
 0x251   :  { %v848_v54 = vpack.c.bf16 %v817_v38, %v816_v37 }
 0x252   :  { %v709_v9 = vpop.f32.mrb[64].mxu1 }
 0x253   :  { %v710_v28 = vadd.f32 %v2067_v36, %v709_v9  ;;  %v1439_v49 = vpop.f32.mrb[65].mxu1  ;;  %1526 = vmatmul.mubr.bf16.gmra.mrb[64].mxu0 %v848_v54 }
 0x254   :  { %v712_v7 = vpop.f32.mrb[66].mxu1  ;;  %1529 = vmatprep.mubr.msk.bf16.mxu0 %vm1772_vm0, %v1771_v0 }
 0x255   :  { %v713_v29 = vadd.f32 %v2067_v36, %v712_v7  ;;  %v1440_v39 = vpop.f32.mrb[67].mxu1  ;;  %v818_v40 = vmax.f32 %v710_v28, 0.0 }
 0x257   :  { %v819_v41 = vmax.f32 %v713_v29, 0.0 }
 0x259   :  { %v849_v42 = vpack.c.bf16 %v819_v41, %v818_v40 }
 0x25a   :  { %v717_v43 = vpop.f32.mrb[68].mxu1 }
 0x25b   :  { %v718_v44 = vadd.f32 %v2067_v36, %v717_v43  ;;  %v1443_v45 = vpop.f32.mrb[69].mxu1  ;;  %1530 = vmatmul.mubr.bf16.gmra.mrb[68].mxu0 %v849_v42 }
 0x25c   :  { %v720_v46 = vpop.f32.mrb[70].mxu1  ;;  %1533 = vmatprep.mubr.msk.bf16.mxu0 %vm1772_vm0, %v1771_v0 }
 0x25d   :  { %v721_v47 = vadd.f32 %v2067_v36, %v720_v46  ;;  %v1444_v48 = vpop.f32.mrb[71].mxu1  ;;  %v820_v50 = vmax.f32 %v718_v44, 0.0 }
 0x25f   :  { %v821_v51 = vmax.f32 %v721_v47, 0.0 }
 0x261   :  { %v850_v52 = vpack.c.bf16 %v821_v51, %v820_v50 }
 0x262   :  { %v725_v53 = vpop.f32.mrb[72].mxu1 }
 0x263   :  { %v726_v55 = vadd.f32 %v2067_v36, %v725_v53  ;;  %v1447_v56 = vpop.f32.mrb[73].mxu1  ;;  %1534 = vmatmul.mubr.bf16.gmra.mrb[72].mxu0 %v850_v52 }
 0x264   :  { %v728_v57 = vpop.f32.mrb[74].mxu1  ;;  %1537 = vmatprep.mubr.msk.bf16.mxu0 %vm1772_vm0, %v1771_v0 }
 0x265   :  { %v729_v58 = vadd.f32 %v2067_v36, %v728_v57  ;;  %v1448_v59 = vpop.f32.mrb[75].mxu1  ;;  %v822_v60 = vmax.f32 %v726_v55, 0.0 }
 0x267   :  { %v823_v61 = vmax.f32 %v729_v58, 0.0 }
 0x269   :  { %v851_v62 = vpack.c.bf16 %v823_v61, %v822_v60 }
 0x26a   :  { %v733_v63 = vpop.f32.mrb[76].mxu1 }
 0x26b   :  { %v734_v1 = vadd.f32 %v2067_v36, %v733_v63  ;;  %v1451_v2 = vpop.f32.mrb[77].mxu1  ;;  %1538 = vmatmul.mubr.bf16.gmra.mrb[76].mxu0 %v851_v62 }
 0x26c   :  { %v736_v3 = vpop.f32.mrb[78].mxu1  ;;  %1541 = vmatprep.mubr.msk.bf16.mxu0 %vm1772_vm0, %v1771_v0 }
 0x26d   :  { %v737_v4 = vadd.f32 %v2067_v36, %v736_v3  ;;  %v1452_v5 = vpop.f32.mrb[79].mxu1  ;;  %v824_v6 = vmax.f32 %v734_v1, 0.0 }
 0x26f   :  { %v825_v8 = vmax.f32 %v737_v4, 0.0 }
 0x271   :  { %v852_v10 = vpack.c.bf16 %v825_v8, %v824_v6 }
 0x272   :  { %v741_v11 = vpop.f32.mrb[80].mxu1 }
 0x273   :  { %v742_v12 = vadd.f32 %v2067_v36, %v741_v11  ;;  %v1455_v13 = vpop.f32.mrb[81].mxu1  ;;  %1542 = vmatmul.mubr.bf16.gmra.mrb[80].mxu0 %v852_v10 }
 0x274   :  { %v744_v14 = vpop.f32.mrb[82].mxu1  ;;  %1545 = vmatprep.mubr.msk.bf16.mxu0 %vm1772_vm0, %v1771_v0 }
 0x275   :  { %v745_v15 = vadd.f32 %v2067_v36, %v744_v14  ;;  %v1456_v16 = vpop.f32.mrb[83].mxu1  ;;  %v826_v17 = vmax.f32 %v742_v12, 0.0 }
 0x277   :  { %v827_v18 = vmax.f32 %v745_v15, 0.0 }
 0x279   :  { %v853_v19 = vpack.c.bf16 %v827_v18, %v826_v17 }
 0x27a   :  { %v749_v20 = vpop.f32.mrb[84].mxu1 }
 0x27b   :  { %v750_v21 = vadd.f32 %v2067_v36, %v749_v20  ;;  %v1459_v22 = vpop.f32.mrb[85].mxu1  ;;  %1546 = vmatmul.mubr.bf16.gmra.mrb[84].mxu0 %v853_v19 }
 0x27c   :  { %v752_v23 = vpop.f32.mrb[86].mxu1  ;;  %1549 = vmatprep.mubr.msk.bf16.mxu0 %vm1772_vm0, %v1771_v0 }
 0x27d   :  { %v753_v24 = vadd.f32 %v2067_v36, %v752_v23  ;;  %v1460_v25 = vpop.f32.mrb[87].mxu1  ;;  %v828_v26 = vmax.f32 %v750_v21, 0.0  ;;  %v2146_v21 = vld [vmem:[%s2204_s6] ss:$0 sm:$0xff]  ;;  %s1773_s6 = smov [#allocation10]  }
 0x27e   :  { %s1160_s28 = sshll.u32 %s1773_s6, 4  ;;  %s1161_s28 = int_to_ptr.vmem [resolvable:$true] %s1160_s28 }
 0x27f   :  { %v829_v27 = vmax.f32 %v753_v24, 0.0  ;;  %s1735_s29 = scalar_lea.vmem %s1161_s28, 4864  ;;  %p1740_p5 = scmp.lt.s32.totalorder %s1161_s28, %s1161_s28 }
 0x280   :  { %p1736_p4 = scmp.ne.s32.totalorder %s1161_s28, %s1735_s29  ;;  %p1741_p6 = scmp.lt.s32.totalorder %s1735_s29, %s1735_s29 }
 0x281   :  { %v854_v30 = vpack.c.bf16 %v829_v27, %v828_v26 }
 0x282   :  { %v757_v31 = vpop.f32.mrb[88].mxu1  ;;  %p1742_p7 = por %p1741_p6, %p1740_p5 }
 0x283   :  { %v758_v32 = vadd.f32 %v2067_v36, %v757_v31  ;;  %v1463_v33 = vpop.f32.mrb[89].mxu1  ;;  %1550 = vmatmul.mubr.bf16.gmra.mrb[88].mxu0 %v854_v30 }
 0x284   :  { %v760_v34 = vpop.f32.mrb[90].mxu1  ;;  %1553 = vmatprep.mubr.msk.bf16.mxu0 %vm1772_vm0, %v1771_v0  ;;  %p1743_p8 = pnand %p1742_p7, %p1736_p4 }
 0x285   :  { %v761_v35 = vadd.f32 %v2067_v36, %v760_v34  ;;  %v1464_v37 = vpop.f32.mrb[91].mxu1  ;;  %v830_v38 = vmax.f32 %v758_v32, 0.0 }
 0x287   :  { %v831_v54 = vmax.f32 %v761_v35, 0.0 }
 0x289   :  { %v855_v9 = vpack.c.bf16 %v831_v54, %v830_v38 }
 0x28a   :  { %v765_v28 = vpop.f32.mrb[92].mxu1 }
 0x28b   :  { %v766_v49 = vadd.f32 %v2067_v36, %v765_v28  ;;  %v1467_v7 = vpop.f32.mrb[93].mxu1  ;;  %1554 = vmatmul.mubr.bf16.gmra.mrb[92].mxu0 %v855_v9 }
 0x28c   :  { %v768_v29 = vpop.f32.mrb[94].mxu1  ;;  %1557 = vmatprep.mubr.msk.bf16.mxu0 %vm1772_vm0, %v1771_v0 }
 0x28d   :  { %v769_v39 = vadd.f32 %v2067_v36, %v768_v29  ;;  %v1468_v40 = vpop.f32.mrb[95].mxu1  ;;  %v832_v41 = vmax.f32 %v766_v49, 0.0 }
 0x28f   :  { %v833_v42 = vmax.f32 %v769_v39, 0.0 }
 0x291   :  { %v856_v43 = vpack.c.bf16 %v833_v42, %v832_v41 }
 0x292   :  { %v773_v44 = vpop.f32.mrb[96].mxu1 }
 0x293   :  { %v774_v45 = vadd.f32 %v2067_v36, %v773_v44  ;;  %v1471_v46 = vpop.f32.mrb[97].mxu1  ;;  %1558 = vmatmul.mubr.bf16.gmra.mrb[96].mxu0 %v856_v43 }
 0x294   :  { %v776_v47 = vpop.f32.mrb[98].mxu1  ;;  %1561 = vmatprep.mubr.msk.bf16.mxu0 %vm1772_vm0, %v1771_v0 }
 0x295   :  { %v777_v48 = vadd.f32 %v2067_v36, %v776_v47  ;;  %v1472_v50 = vpop.f32.mrb[99].mxu1  ;;  %v834_v51 = vmax.f32 %v774_v45, 0.0 }
 0x297   :  { %v835_v52 = vmax.f32 %v777_v48, 0.0 }
 0x299   :  { %v857_v53 = vpack.c.bf16 %v835_v52, %v834_v51 }
 0x29a   :  { %v781_v55 = vpop.f32.mrb[100].mxu1 }
 0x29b   :  { %v782_v56 = vadd.f32 %v2067_v36, %v781_v55  ;;  %v1475_v57 = vpop.f32.mrb[101].mxu1  ;;  %1562 = vmatmul.mubr.bf16.gmra.mrb[100].mxu0 %v857_v53 }
 0x29c   :  { %v784_v58 = vpop.f32.mrb[102].mxu1  ;;  %1565 = vmatprep.mubr.msk.bf16.mxu0 %vm1772_vm0, %v1771_v0 }
 0x29d   :  { %v785_v59 = vadd.f32 %v2067_v36, %v784_v58  ;;  %v1476_v60 = vpop.f32.mrb[103].mxu1  ;;  %v836_v61 = vmax.f32 %v782_v56, 0.0 }
 0x29f   :  { %v837_v62 = vmax.f32 %v785_v59, 0.0 }
 0x2a1   :  { %v858_v63 = vpack.c.bf16 %v837_v62, %v836_v61 }
 0x2a2   :  { %v789_v1 = vpop.f32.mrb[104].mxu1 }
 0x2a3   :  { %v790_v2 = vadd.f32 %v2067_v36, %v789_v1  ;;  %v1479_v3 = vpop.f32.mrb[105].mxu1  ;;  %1566 = vmatmul.mubr.bf16.gmra.mrb[104].mxu0 %v858_v63 }
 0x2a4   :  { %v792_v4 = vpop.f32.mrb[106].mxu1  ;;  %1569 = vmatprep.mubr.msk.bf16.mxu0 %vm1772_vm0, %v1771_v0 }
 0x2a5   :  { %v793_v5 = vadd.f32 %v2067_v36, %v792_v4  ;;  %v1480_v6 = vpop.f32.mrb[107].mxu1  ;;  %v838_v8 = vmax.f32 %v790_v2, 0.0 }
 0x2a7   :  { %v839_v10 = vmax.f32 %v793_v5, 0.0 }
 0x2a9   :  { %v859_v11 = vpack.c.bf16 %v839_v10, %v838_v8 }
 0x2aa   :  { %v797_v12 = vpop.f32.mrb[108].mxu1 }
 0x2ab   :  { %v798_v13 = vadd.f32 %v2067_v36, %v797_v12  ;;  %v1483_v14 = vpop.f32.mrb[109].mxu1  ;;  %1570 = vmatmul.mubr.bf16.gmra.mrb[108].mxu0 %v859_v11 }
 0x2ac   :  { %v800_v15 = vpop.f32.mrb[110].mxu1  ;;  %1573 = vmatprep.mubr.msk.bf16.mxu0 %vm1772_vm0, %v1771_v0 }
 0x2ad   :  { %v801_v16 = vadd.f32 %v2067_v36, %v800_v15  ;;  %v1484_v17 = vpop.f32.mrb[111].mxu1  ;;  %v840_v18 = vmax.f32 %v798_v13, 0.0 }
 0x2af   :  { %v841_v19 = vmax.f32 %v801_v16, 0.0 }
 0x2b1   :  { %v860_v20 = vpack.c.bf16 %v841_v19, %v840_v18 }
 0x2b3   :  { %1574 = vmatmul.mubr.bf16.gmra.mrb[112].mxu0 %v860_v20 }
 0x2f6   :  { %v966_v22 = vpop.f32.mrb[40].mxu0 }
 0x2f7   :  { %v967_v23 = vadd.f32 %v2146_v21, %v966_v22  ;;  %v1503_v24 = vpop.f32.mrb[41].mxu0 }
 0x2f8   :  { %v969_v25 = vpop.f32.mrb[42].mxu0 }
 0x2f9   :  { %1117 = vst [vmem:[#allocation10] sm:$0xff] %v967_v23  ;;  %v970_v0 = vadd.f32 %v2146_v21, %v969_v25  ;;  %v1504_v26 = vpop.f32.mrb[43].mxu0 }
 0x2fb   :  { %1118 = vst [vmem:[#allocation10 + $0x8] sm:$0xff] %v970_v0 }
 0x2fe   :  { %v974_v36 = vpop.f32.mrb[44].mxu0 }
 0x2ff   :  { %v975_v27 = vadd.f32 %v2146_v21, %v974_v36  ;;  %v1507_v30 = vpop.f32.mrb[45].mxu0 }
 0x300   :  { %v977_v31 = vpop.f32.mrb[46].mxu0 }
 0x301   :  { %1119 = vst [vmem:[#allocation10 + $0x10] sm:$0xff] %v975_v27  ;;  %v978_v32 = vadd.f32 %v2146_v21, %v977_v31  ;;  %v1508_v33 = vpop.f32.mrb[47].mxu0 }
 0x303   :  { %1120 = vst [vmem:[#allocation10 + $0x18] sm:$0xff] %v978_v32 }
 0x306   :  { %v982_v34 = vpop.f32.mrb[48].mxu0 }
 0x307   :  { %v983_v35 = vadd.f32 %v2146_v21, %v982_v34  ;;  %v1511_v37 = vpop.f32.mrb[49].mxu0 }
 0x308   :  { %v985_v38 = vpop.f32.mrb[50].mxu0 }
 0x309   :  { %1121 = vst [vmem:[#allocation10 + $0x20] sm:$0xff] %v983_v35  ;;  %v986_v54 = vadd.f32 %v2146_v21, %v985_v38  ;;  %v1512_v9 = vpop.f32.mrb[51].mxu0 }
 0x30b   :  { %1122 = vst [vmem:[#allocation10 + $0x28] sm:$0xff] %v986_v54 }
 0x30e   :  { %v990_v28 = vpop.f32.mrb[52].mxu0 }
 0x30f   :  { %v991_v49 = vadd.f32 %v2146_v21, %v990_v28  ;;  %v1515_v7 = vpop.f32.mrb[53].mxu0 }
 0x310   :  { %v993_v29 = vpop.f32.mrb[54].mxu0 }
 0x311   :  { %1123 = vst [vmem:[#allocation10 + $0x30] sm:$0xff] %v991_v49  ;;  %v994_v39 = vadd.f32 %v2146_v21, %v993_v29  ;;  %v1516_v40 = vpop.f32.mrb[55].mxu0 }
 0x313   :  { %1124 = vst [vmem:[#allocation10 + $0x38] sm:$0xff] %v994_v39 }
 0x316   :  { %v998_v41 = vpop.f32.mrb[56].mxu0 }
 0x317   :  { %v999_v42 = vadd.f32 %v2146_v21, %v998_v41  ;;  %v1519_v43 = vpop.f32.mrb[57].mxu0 }
 0x318   :  { %v1001_v44 = vpop.f32.mrb[58].mxu0 }
 0x319   :  { %1125 = vst [vmem:[#allocation10 + $0x40] sm:$0xff] %v999_v42  ;;  %v1002_v45 = vadd.f32 %v2146_v21, %v1001_v44  ;;  %v1520_v46 = vpop.f32.mrb[59].mxu0 }
 0x31b   :  { %1126 = vst [vmem:[#allocation10 + $0x48] sm:$0xff] %v1002_v45 }
 0x31e   :  { %v1006_v47 = vpop.f32.mrb[60].mxu0 }
 0x31f   :  { %v1007_v48 = vadd.f32 %v2146_v21, %v1006_v47  ;;  %v1523_v50 = vpop.f32.mrb[61].mxu0 }
 0x320   :  { %v1009_v51 = vpop.f32.mrb[62].mxu0 }
 0x321   :  { %1127 = vst [vmem:[#allocation10 + $0x50] sm:$0xff] %v1007_v48  ;;  %v1010_v52 = vadd.f32 %v2146_v21, %v1009_v51  ;;  %v1524_v53 = vpop.f32.mrb[63].mxu0 }
 0x323   :  { %1128 = vst [vmem:[#allocation10 + $0x58] sm:$0xff] %v1010_v52 }
 0x326   :  { %v1014_v55 = vpop.f32.mrb[64].mxu0 }
 0x327   :  { %v1015_v56 = vadd.f32 %v2146_v21, %v1014_v55  ;;  %v1527_v57 = vpop.f32.mrb[65].mxu0 }
 0x328   :  { %v1017_v58 = vpop.f32.mrb[66].mxu0 }
 0x329   :  { %1129 = vst [vmem:[#allocation10 + $0x60] sm:$0xff] %v1015_v56  ;;  %v1018_v59 = vadd.f32 %v2146_v21, %v1017_v58  ;;  %v1528_v60 = vpop.f32.mrb[67].mxu0 }
 0x32b   :  { %1130 = vst [vmem:[#allocation10 + $0x68] sm:$0xff] %v1018_v59 }
 0x32e   :  { %v1022_v61 = vpop.f32.mrb[68].mxu0 }
 0x32f   :  { %v1023_v62 = vadd.f32 %v2146_v21, %v1022_v61  ;;  %v1531_v63 = vpop.f32.mrb[69].mxu0 }
 0x330   :  { %v1025_v1 = vpop.f32.mrb[70].mxu0 }
 0x331   :  { %1131 = vst [vmem:[#allocation10 + $0x70] sm:$0xff] %v1023_v62  ;;  %v1026_v2 = vadd.f32 %v2146_v21, %v1025_v1  ;;  %v1532_v3 = vpop.f32.mrb[71].mxu0 }
 0x333   :  { %1132 = vst [vmem:[#allocation10 + $0x78] sm:$0xff] %v1026_v2 }
 0x336   :  { %v1030_v4 = vpop.f32.mrb[72].mxu0 }
 0x337   :  { %v1031_v5 = vadd.f32 %v2146_v21, %v1030_v4  ;;  %v1535_v6 = vpop.f32.mrb[73].mxu0 }
 0x338   :  { %v1033_v8 = vpop.f32.mrb[74].mxu0 }
 0x339   :  { %1133 = vst [vmem:[#allocation10 + $0x80] sm:$0xff] %v1031_v5  ;;  %v1034_v10 = vadd.f32 %v2146_v21, %v1033_v8  ;;  %v1536_v11 = vpop.f32.mrb[75].mxu0 }
 0x33b   :  { %1134 = vst [vmem:[#allocation10 + $0x88] sm:$0xff] %v1034_v10 }
 0x33e   :  { %v1038_v12 = vpop.f32.mrb[76].mxu0 }
 0x33f   :  { %v1039_v13 = vadd.f32 %v2146_v21, %v1038_v12  ;;  %v1539_v14 = vpop.f32.mrb[77].mxu0 }
 0x340   :  { %v1041_v15 = vpop.f32.mrb[78].mxu0 }
 0x341   :  { %1135 = vst [vmem:[#allocation10 + $0x90] sm:$0xff] %v1039_v13  ;;  %v1042_v16 = vadd.f32 %v2146_v21, %v1041_v15  ;;  %v1540_v17 = vpop.f32.mrb[79].mxu0 }
 0x343   :  { %1136 = vst [vmem:[#allocation10 + $0x98] sm:$0xff] %v1042_v16 }
 0x346   :  { %v1046_v18 = vpop.f32.mrb[80].mxu0 }
 0x347   :  { %v1047_v19 = vadd.f32 %v2146_v21, %v1046_v18  ;;  %v1543_v20 = vpop.f32.mrb[81].mxu0 }
 0x348   :  { %v1049_v22 = vpop.f32.mrb[82].mxu0 }
 0x349   :  { %1137 = vst [vmem:[#allocation10 + $0xa0] sm:$0xff] %v1047_v19  ;;  %v1050_v23 = vadd.f32 %v2146_v21, %v1049_v22  ;;  %v1544_v24 = vpop.f32.mrb[83].mxu0 }
 0x34b   :  { %1138 = vst [vmem:[#allocation10 + $0xa8] sm:$0xff] %v1050_v23 }
 0x34e   :  { %v1054_v25 = vpop.f32.mrb[84].mxu0 }
 0x34f   :  { %v1055_v0 = vadd.f32 %v2146_v21, %v1054_v25  ;;  %v1547_v26 = vpop.f32.mrb[85].mxu0 }
 0x350   :  { %v1057_v36 = vpop.f32.mrb[86].mxu0 }
 0x351   :  { %1139 = vst [vmem:[#allocation10 + $0xb0] sm:$0xff] %v1055_v0  ;;  %v1058_v27 = vadd.f32 %v2146_v21, %v1057_v36  ;;  %v1548_v30 = vpop.f32.mrb[87].mxu0 }
 0x353   :  { %1140 = vst [vmem:[#allocation10 + $0xb8] sm:$0xff] %v1058_v27 }
 0x356   :  { %v1062_v31 = vpop.f32.mrb[88].mxu0 }
 0x357   :  { %v1063_v32 = vadd.f32 %v2146_v21, %v1062_v31  ;;  %v1551_v33 = vpop.f32.mrb[89].mxu0 }
 0x358   :  { %v1065_v34 = vpop.f32.mrb[90].mxu0 }
 0x359   :  { %1141 = vst [vmem:[#allocation10 + $0xc0] sm:$0xff] %v1063_v32  ;;  %v1066_v35 = vadd.f32 %v2146_v21, %v1065_v34  ;;  %v1552_v37 = vpop.f32.mrb[91].mxu0 }
 0x35b   :  { %1142 = vst [vmem:[#allocation10 + $0xc8] sm:$0xff] %v1066_v35 }
 0x35e   :  { %v1070_v38 = vpop.f32.mrb[92].mxu0 }
 0x35f   :  { %v1071_v54 = vadd.f32 %v2146_v21, %v1070_v38  ;;  %v1555_v9 = vpop.f32.mrb[93].mxu0 }
 0x360   :  { %v1073_v28 = vpop.f32.mrb[94].mxu0 }
 0x361   :  { %1143 = vst [vmem:[#allocation10 + $0xd0] sm:$0xff] %v1071_v54  ;;  %v1074_v49 = vadd.f32 %v2146_v21, %v1073_v28  ;;  %v1556_v7 = vpop.f32.mrb[95].mxu0 }
 0x363   :  { %1144 = vst [vmem:[#allocation10 + $0xd8] sm:$0xff] %v1074_v49 }
 0x366   :  { %v1078_v29 = vpop.f32.mrb[96].mxu0 }
 0x367   :  { %v1079_v39 = vadd.f32 %v2146_v21, %v1078_v29  ;;  %v1559_v40 = vpop.f32.mrb[97].mxu0 }
 0x368   :  { %v1081_v41 = vpop.f32.mrb[98].mxu0 }
 0x369   :  { %1145 = vst [vmem:[#allocation10 + $0xe0] sm:$0xff] %v1079_v39  ;;  %v1082_v42 = vadd.f32 %v2146_v21, %v1081_v41  ;;  %v1560_v43 = vpop.f32.mrb[99].mxu0 }
 0x36b   :  { %1146 = vst [vmem:[#allocation10 + $0xe8] sm:$0xff] %v1082_v42 }
 0x36e   :  { %v1086_v44 = vpop.f32.mrb[100].mxu0 }
 0x36f   :  { %v1087_v45 = vadd.f32 %v2146_v21, %v1086_v44  ;;  %v1563_v46 = vpop.f32.mrb[101].mxu0 }
 0x370   :  { %v1089_v47 = vpop.f32.mrb[102].mxu0 }
 0x371   :  { %1147 = vst [vmem:[#allocation10 + $0xf0] sm:$0xff] %v1087_v45  ;;  %v1090_v48 = vadd.f32 %v2146_v21, %v1089_v47  ;;  %v1564_v50 = vpop.f32.mrb[103].mxu0 }
 0x373   :  { %1148 = vst [vmem:[#allocation10 + $0xf8] sm:$0xff] %v1090_v48 }
 0x376   :  { %v1094_v51 = vpop.f32.mrb[104].mxu0 }
 0x377   :  { %v1095_v52 = vadd.f32 %v2146_v21, %v1094_v51  ;;  %v1567_v53 = vpop.f32.mrb[105].mxu0 }
 0x378   :  { %v1097_v55 = vpop.f32.mrb[106].mxu0 }
 0x379   :  { %1149 = vst [vmem:[#allocation10 + $0x100] sm:$0xff] %v1095_v52  ;;  %v1098_v56 = vadd.f32 %v2146_v21, %v1097_v55  ;;  %v1568_v57 = vpop.f32.mrb[107].mxu0 }
 0x37b   :  { %1150 = vst [vmem:[#allocation10 + $0x108] sm:$0xff] %v1098_v56 }
 0x37e   :  { %v1102_v58 = vpop.f32.mrb[108].mxu0 }
 0x37f   :  { %v1103_v59 = vadd.f32 %v2146_v21, %v1102_v58  ;;  %v1571_v60 = vpop.f32.mrb[109].mxu0 }
 0x380   :  { %v1105_v61 = vpop.f32.mrb[110].mxu0 }
 0x381   :  { %1151 = vst [vmem:[#allocation10 + $0x110] sm:$0xff] %v1103_v59  ;;  %v1106_v62 = vadd.f32 %v2146_v21, %v1105_v61  ;;  %v1572_v63 = vpop.f32.mrb[111].mxu0 }
 0x383   :  { %1152 = vst [vmem:[#allocation10 + $0x118] sm:$0xff] %v1106_v62 }
 0x386   :  { %v1110_v1 = vpop.f32.mrb[112].mxu0 }
 0x387   :  { %v1111_v2 = vadd.f32 %v2146_v21, %v1110_v1  ;;  %v1575_v3 = vpop.f32.mrb[113].mxu0 }
 0x388   :  { %v1113_v4 = vpop.f32.mrb[114].mxu0 }
 0x389   :  { %1153 = vst [vmem:[#allocation10 + $0x120] sm:$0xff] %v1111_v2  ;;  %v1114_v5 = vadd.f32 %v2146_v21, %v1113_v4  ;;  %v1576_v6 = vpop.f32.mrb[115].mxu0 }
 0x38b   :  { %1154 = vst [vmem:[#allocation10 + $0x128] sm:$0xff] %v1114_v5 }
 0x38c   :  { %1746 = shalt.err (!%p1743_p8)
}
 0x38d   :  { %s1747_s9 = scalar_lea.hbm %s2205_s7, 4864 }
 0x38e   :  { %p1748_p9 = scmp.ne.s32.totalorder %s2205_s7, %s1747_s9  ;;  %p1751_p10 = scmp.lt.u32.totalorder %s1747_s9, %s2205_s7 }
 0x390   :  { %p1753_p11 = pnand %p1751_p10, %p1748_p9 }
 0x392   :  { %1756 = shalt.err (!%p1753_p11)
}
 0x393   :  { %s1774_s16 = smov 128   ;;  %s1775_s0 = smov 8  }
 0x394   :  { %1166 = dma.vmem_to_hbm [thread:$0]  %s1161_s28, 4864, %s2205_s7, [#allocation4], %s1774_s16, %s1774_s16, %s1775_s0  }
 0x395   :  { %1763 = dma.done.wait [#allocation4], 4864  }
 0x396   :  { %1764 = vsyncadd [#allocation4], 4294962432 }
 0x397   :  { %1170 = vsyncpa [#allocation3], 1 }
 0x398   :  { %1171 = vsyncpa [#allocation6], 1 }
 0x399   :  { %1172 = vsyncpa [#allocation9], 1 }
 0x39a   :  { %1173 = vsyncpa [#allocation4], 1 }

// kernel: tpu_custom_call.1
= control target key start
LH: loop header
LB: loop body
LE: loop exit
PB: predicated region body
PF: predicated region fallthrough
CT: control target
= control target key end

     0   :  { %12 = vsyncpa [#allocation3], 0  ;;  %s2198_s0 = inlined_call_operand.hbm [shape: bf16[304,128], index: 0, kind: input, shape index: {}]   ;;  %s2199_s1 = inlined_call_operand.hbm [shape: bf16[128,128], index: 1, kind: input, shape index: {}]   ;;  %s2200_s2 = inlined_call_operand.hbm [shape: bf16[128,128], index: 2, kind: input, shape index: {}]   ;;  %s2201_s3 = inlined_call_operand.hbm [shape: bf16[128,128], index: 3, kind: input, shape index: {}]   ;;  %s2202_s4 = inlined_call_operand.vmem [shape: f32[1,128], index: 4, kind: input, shape index: {}]   ;;  %s2203_s5 = inlined_call_operand.vmem [shape: f32[1,128], index: 5, kind: input, shape index: {}]   ;;  %s2204_s6 = inlined_call_operand.vmem [shape: f32[1,128], index: 6, kind: input, shape index: {}]   ;;  %s2205_s7 = inlined_call_operand.hbm [shape: f32[304,128], index: 7, kind: output, shape index: {}]  }
   0x1   :  { %13 = vsyncpa [#allocation6], 0 }
   0x2   :  { %14 = vsyncpa [#allocation9], 0 }
   0x3   :  { %15 = vsyncpa [#allocation4], 0  ;;  %s1765_s24 = smov [#allocation5]   ;;  %s1766_s26 = smov [#allocation2]  }
   0x4   :  { %s33_s25 = sshll.u32 %s1765_s24, 4  ;;  %s21_s27 = sshll.u32 %s1766_s26, 4  ;;  %s34_s25 = int_to_ptr.vmem [resolvable:$true] %s33_s25  ;;  %s1816_s27 = int_to_ptr.vmem [resolvable:$true] %s21_s27 }
   0x5   :  { %s1647_s30 = scalar_lea.hbm %s2199_s1, 1024 }
   0x6   :  { %p1648_p0 = scmp.ne.s32.totalorder %s2199_s1, %s1647_s30  ;;  %p1651_p1 = scmp.lt.u32.totalorder %s1647_s30, %s2199_s1 }
   0x8   :  { %p1653_p2 = pnand %p1651_p1, %p1648_p0 }
   0xa   :  { %1656 = shalt.err (!%p1653_p2)
}
   0xb   :  { %s1657_s12 = scalar_lea.vmem %s34_s25, 1024  ;;  %p1662_p4 = scmp.lt.s32.totalorder %s34_s25, %s34_s25 }
   0xc   :  { %p1658_p3 = scmp.ne.s32.totalorder %s34_s25, %s1657_s12  ;;  %p1663_p5 = scmp.lt.s32.totalorder %s1657_s12, %s1657_s12 }
   0xe   :  { %p1664_p6 = por %p1663_p5, %p1662_p4 }
  0x10   :  { %p1665_p7 = pnand %p1664_p6, %p1658_p3 }
  0x12   :  { %1668 = shalt.err (!%p1665_p7)
}
  0x13   :  { %s1767_s13 = smov 64   ;;  %s1768_s14 = smov 4  }
  0x14   :  { %39 = dma.hbm_to_vmem [thread:$0]  %s2199_s1, 1024, %s34_s25, [#allocation6], %s1767_s13, %s1767_s13, %s1768_s14  }
  0x15   :  { %s1669_s19 = scalar_lea.hbm %s2198_s0, 2432 }
  0x16   :  { %p1670_p8 = scmp.ne.s32.totalorder %s2198_s0, %s1669_s19  ;;  %p1673_p9 = scmp.lt.u32.totalorder %s1669_s19, %s2198_s0 }
  0x18   :  { %p1675_p10 = pnand %p1673_p9, %p1670_p8 }
  0x1a   :  { %1678 = shalt.err (!%p1675_p10)
}
  0x1b   :  { %s1679_s24 = scalar_lea.vmem %s1816_s27, 2432  ;;  %p1684_p12 = scmp.lt.s32.totalorder %s1816_s27, %s1816_s27 }
  0x1c   :  { %p1680_p11 = scmp.ne.s32.totalorder %s1816_s27, %s1679_s24  ;;  %p1685_p13 = scmp.lt.s32.totalorder %s1679_s24, %s1679_s24 }
  0x1e   :  { %p1686_p0 = por %p1685_p13, %p1684_p12 }
  0x20   :  { %p1687_p1 = pnand %p1686_p0, %p1680_p11 }
  0x22   :  { %1690 = shalt.err (!%p1687_p1)
}
  0x23   :  { %27 = dma.hbm_to_vmem [thread:$0]  %s2198_s0, 2432, %s1816_s27, [#allocation3], %s1767_s13, %s1767_s13, %s1768_s14  }
  0x24   :  { %s1769_s26 = smov [#allocation7]   ;;  %s1770_s29 = smov [#allocation8]  }
  0x25   :  { %s45_s28 = sshll.u32 %s1769_s26, 4  ;;  %s57_s30 = sshll.u32 %s1770_s29, 4  ;;  %s46_s28 = int_to_ptr.vmem [resolvable:$true] %s45_s28  ;;  %s1853_s30 = int_to_ptr.vmem [resolvable:$true] %s57_s30 }
  0x26   :  { %s1691_s10 = scalar_lea.hbm %s2200_s2, 1024 }
  0x27   :  { %p1692_p2 = scmp.ne.s32.totalorder %s2200_s2, %s1691_s10  ;;  %p1695_p3 = scmp.lt.u32.totalorder %s1691_s10, %s2200_s2 }
  0x29   :  { %p1697_p4 = pnand %p1695_p3, %p1692_p2 }
  0x2b   :  { %1700 = shalt.err (!%p1697_p4)
}
  0x2c   :  { %s1701_s0 = scalar_lea.vmem %s46_s28, 1024  ;;  %p1706_p6 = scmp.lt.s32.totalorder %s46_s28, %s46_s28 }
  0x2d   :  { %p1702_p5 = scmp.ne.s32.totalorder %s46_s28, %s1701_s0  ;;  %p1707_p7 = scmp.lt.s32.totalorder %s1701_s0, %s1701_s0 }
  0x2f   :  { %p1708_p8 = por %p1707_p7, %p1706_p6 }
  0x31   :  { %p1709_p9 = pnand %p1708_p8, %p1702_p5 }
  0x33   :  { %1712 = shalt.err (!%p1709_p9)
}
  0x34   :  { %51 = dma.hbm_to_vmem [thread:$0]  %s2200_s2, 1024, %s46_s28, [#allocation6], %s1767_s13, %s1767_s13, %s1768_s14  }
  0x35   :  { %s1713_s20 = scalar_lea.hbm %s2201_s3, 1024 }
  0x36   :  { %p1714_p10 = scmp.ne.s32.totalorder %s2201_s3, %s1713_s20  ;;  %p1717_p11 = scmp.lt.u32.totalorder %s1713_s20, %s2201_s3 }
  0x38   :  { %p1719_p12 = pnand %p1717_p11, %p1714_p10 }
  0x3a   :  { %1722 = shalt.err (!%p1719_p12)
}
  0x3b   :  { %s1723_s1 = scalar_lea.vmem %s1853_s30, 1024  ;;  %p1728_p0 = scmp.lt.s32.totalorder %s1853_s30, %s1853_s30 }
  0x3c   :  { %p1724_p13 = scmp.ne.s32.totalorder %s1853_s30, %s1723_s1  ;;  %p1729_p1 = scmp.lt.s32.totalorder %s1723_s1, %s1723_s1 }
  0x3e   :  { %p1730_p2 = por %p1729_p1, %p1728_p0 }
  0x40   :  { %p1731_p3 = pnand %p1730_p2, %p1724_p13 }
  0x42   :  { %1734 = shalt.err (!%p1731_p3)
}
  0x43   :  { %63 = dma.hbm_to_vmem [thread:$0]  %s2201_s3, 1024, %s1853_s30, [#allocation9], %s1767_s13, %s1767_s13, %s1768_s14  }
  0x44   :  { %1757 = dma.done.wait [#allocation3], 2432  }
  0x45   :  { %1758 = vsyncadd [#allocation3], 4294964864 }
  0x46   :  { %1759 = dma.done.wait [#allocation6], 2048  }
  0x47   :  { %1760 = vsyncadd [#allocation6], 4294965248 }
  0x48   :  { %1761 = dma.done.wait [#allocation9], 1024  }
  0x49   :  { %1762 = vsyncadd [#allocation9], 4294966272  ;;  %v1771_v0 = vmov 0.0   ;;  %vm1772_vm0 = vmmov 0   ;;  %v1604_v1 = vld [vmem:[#allocation5] sm:$0xff]   ;;  %v1605_v2 = vld [vmem:[#allocation5 + $0x8] sm:$0xff]  }
  0x4a   :  { %1301 = vmatprep.subr.bf16.mxu0 %v1771_v0  ;;  %1317 = vmatprep.mubr.msk.bf16.mxu0 %vm1772_vm0, %v1771_v0  ;;  %v1606_v3 = vld [vmem:[#allocation5 + $0x10] sm:$0xff]   ;;  %v1607_v4 = vld [vmem:[#allocation5 + $0x18] sm:$0xff]   ;;  %v1608_v5 = vld [vmem:[#allocation5 + $0x20] sm:$0xff]  }
  0x4b   :  { %1577 = vmatprep.subr.bf16.mxu1 %v1771_v0  ;;  %1357 = vmatprep.mubr.msk.bf16.mxu1 %vm1772_vm0, %v1771_v0  ;;  %v1609_v6 = vld [vmem:[#allocation5 + $0x28] sm:$0xff]   ;;  %v1610_v7 = vld [vmem:[#allocation5 + $0x30] sm:$0xff]   ;;  %v1611_v8 = vld [vmem:[#allocation5 + $0x38] sm:$0xff]  }
  0x4c   :  { %1302 = vmatpush3.bf16.msra.mxu0 %v1604_v1  ;;  %1585 = vmatpush3.bf16.msra.mxu1 %v1604_v1  ;;  %v1612_v9 = vld [vmem:[#allocation2] sm:$0xff]   ;;  %v1622_v10 = vld [vmem:[#allocation2 + $0x50] sm:$0xff]   ;;  %v1631_v11 = vld [vmem:[#allocation7] sm:$0xff]  }
  0x4d   :  { %1303 = vmatprep.subr.bf16.mxu0 %v1771_v0  ;;  %1578 = vmatprep.subr.bf16.mxu1 %v1771_v0  ;;  %v1632_v12 = vld [vmem:[#allocation7 + $0x8] sm:$0xff]   ;;  %v1613_v13 = vld [vmem:[#allocation2 + $0x8] sm:$0xff]   ;;  %v1623_v14 = vld [vmem:[#allocation2 + $0x58] sm:$0xff]  }
  0x4e   :  { %v1633_v15 = vld [vmem:[#allocation7 + $0x10] sm:$0xff]   ;;  %v1634_v16 = vld [vmem:[#allocation7 + $0x18] sm:$0xff]   ;;  %v1624_v18 = vld [vmem:[#allocation2 + $0x60] sm:$0xff]  }
  0x4f   :  { %v1614_v17 = vld [vmem:[#allocation2 + $0x10] sm:$0xff]   ;;  %v1635_v19 = vld [vmem:[#allocation7 + $0x20] sm:$0xff]   ;;  %v1636_v20 = vld [vmem:[#allocation7 + $0x28] sm:$0xff]  }
  0x50   :  { %1304 = vmatpush3.bf16.msra.mxu0 %v1605_v2  ;;  %1586 = vmatpush3.bf16.msra.mxu1 %v1605_v2  ;;  %v1615_v21 = vld [vmem:[#allocation2 + $0x18] sm:$0xff]   ;;  %v1625_v22 = vld [vmem:[#allocation2 + $0x68] sm:$0xff]   ;;  %v1616_v24 = vld [vmem:[#allocation2 + $0x20] sm:$0xff]  }
  0x51   :  { %1305 = vmatprep.subr.bf16.mxu0 %v1771_v0  ;;  %1579 = vmatprep.subr.bf16.mxu1 %v1771_v0  ;;  %v1637_v23 = vld [vmem:[#allocation7 + $0x30] sm:$0xff]   ;;  %v1626_v25 = vld [vmem:[#allocation2 + $0x70] sm:$0xff]   ;;  %v1627_v27 = vld [vmem:[#allocation2 + $0x78] sm:$0xff]  }
  0x52   :  { %v1617_v26 = vld [vmem:[#allocation2 + $0x28] sm:$0xff]   ;;  %v1618_v28 = vld [vmem:[#allocation2 + $0x30] sm:$0xff]   ;;  %v1628_v29 = vld [vmem:[#allocation2 + $0x80] sm:$0xff]  }
  0x53   :  { %v1619_v30 = vld [vmem:[#allocation2 + $0x38] sm:$0xff]   ;;  %v1629_v31 = vld [vmem:[#allocation2 + $0x88] sm:$0xff]   ;;  %v1620_v32 = vld [vmem:[#allocation2 + $0x40] sm:$0xff]  }
  0x54   :  { %1306 = vmatpush3.bf16.msra.mxu0 %v1606_v3  ;;  %1587 = vmatpush3.bf16.msra.mxu1 %v1606_v3  ;;  %v1630_v33 = vld [vmem:[#allocation2 + $0x90] sm:$0xff]   ;;  %v1621_v34 = vld [vmem:[#allocation2 + $0x48] sm:$0xff]   ;;  %v1960_v36 = vld [vmem:[%s2202_s4] ss:$0 sm:$0xff] }
  0x55   :  { %1307 = vmatprep.subr.bf16.mxu0 %v1771_v0  ;;  %1580 = vmatprep.subr.bf16.mxu1 %v1771_v0  ;;  %v1638_v35 = vld [vmem:[#allocation7 + $0x38] sm:$0xff]  }
  0x58   :  { %1308 = vmatpush3.bf16.msra.mxu0 %v1607_v4  ;;  %1588 = vmatpush3.bf16.msra.mxu1 %v1607_v4 }
  0x59   :  { %1309 = vmatprep.subr.bf16.mxu0 %v1771_v0  ;;  %1581 = vmatprep.subr.bf16.mxu1 %v1771_v0 }
  0x5c   :  { %1310 = vmatpush3.bf16.msra.mxu0 %v1608_v5  ;;  %1589 = vmatpush3.bf16.msra.mxu1 %v1608_v5 }
  0x5d   :  { %1311 = vmatprep.subr.bf16.mxu0 %v1771_v0  ;;  %1582 = vmatprep.subr.bf16.mxu1 %v1771_v0 }
  0x60   :  { %1312 = vmatpush3.bf16.msra.mxu0 %v1609_v6  ;;  %1590 = vmatpush3.bf16.msra.mxu1 %v1609_v6 }
  0x61   :  { %1313 = vmatprep.subr.bf16.mxu0 %v1771_v0  ;;  %1583 = vmatprep.subr.bf16.mxu1 %v1771_v0 }
  0x64   :  { %1314 = vmatpush3.bf16.msra.mxu0 %v1610_v7  ;;  %1591 = vmatpush3.bf16.msra.mxu1 %v1610_v7 }
  0x65   :  { %1315 = vmatprep.subr.bf16.mxu0 %v1771_v0  ;;  %1584 = vmatprep.subr.bf16.mxu1 %v1771_v0 }
  0x68   :  { %1316 = vmatpush3.bf16.msra.mxu0 %v1611_v8  ;;  %1592 = vmatpush3.bf16.msra.mxu1 %v1611_v8 }
  0x69   :  { %1393 = vmatprep.subr.bf16.mxu1 %v1771_v0  ;;  %1485 = vmatprep.subr.bf16.mxu0 %v1771_v0 }
  0x6b   :  { %1318 = vmatmul.mubr.bf16.vlgmr.msra.gmra.mrb[0].mxu0 %v1612_v9  ;;  %1358 = vmatmul.mubr.bf16.vlgmr.msra.gmra.mrb[0].mxu1 %v1622_v10 }
  0x6c   :  { %1321 = vmatprep.mubr.msk.bf16.mxu0 %vm1772_vm0, %v1771_v0  ;;  %1361 = vmatprep.mubr.msk.bf16.mxu1 %vm1772_vm0, %v1771_v0 }
  0x6d   :  { %1394 = vmatpush3.bf16.msra.mxu1 %v1631_v11 }
  0x6e   :  { %1395 = vmatprep.subr.bf16.mxu1 %v1771_v0 }
  0x71   :  { %1396 = vmatpush3.bf16.msra.mxu1 %v1632_v12 }
  0x72   :  { %1397 = vmatprep.subr.bf16.mxu1 %v1771_v0 }
  0x73   :  { %1322 = vmatmul.mubr.bf16.gmra.mrb[4].mxu0 %v1613_v13  ;;  %1362 = vmatmul.mubr.bf16.gmra.mrb[4].mxu1 %v1623_v14 }
  0x74   :  { %1325 = vmatprep.mubr.msk.bf16.mxu0 %vm1772_vm0, %v1771_v0  ;;  %1365 = vmatprep.mubr.msk.bf16.mxu1 %vm1772_vm0, %v1771_v0 }
  0x75   :  { %1398 = vmatpush3.bf16.msra.mxu1 %v1633_v15 }
  0x76   :  { %1399 = vmatprep.subr.bf16.mxu1 %v1771_v0 }
  0x79   :  { %1400 = vmatpush3.bf16.msra.mxu1 %v1634_v16  ;;  %v1639_v16 = vld [vmem:[#allocation8] sm:$0xff]  }
  0x7a   :  { %1401 = vmatprep.subr.bf16.mxu1 %v1771_v0  ;;  %1486 = vmatpush3.bf16.msra.mxu0 %v1639_v16 }
  0x7b   :  { %1326 = vmatmul.mubr.bf16.gmra.mrb[8].mxu0 %v1614_v17  ;;  %1366 = vmatmul.mubr.bf16.gmra.mrb[8].mxu1 %v1624_v18 }
  0x7c   :  { %1329 = vmatprep.mubr.msk.bf16.mxu0 %vm1772_vm0, %v1771_v0  ;;  %1369 = vmatprep.mubr.msk.bf16.mxu1 %vm1772_vm0, %v1771_v0 }
  0x7d   :  { %1402 = vmatpush3.bf16.msra.mxu1 %v1635_v19  ;;  %1487 = vmatprep.subr.bf16.mxu0 %v1771_v0 }
  0x7e   :  { %1403 = vmatprep.subr.bf16.mxu1 %v1771_v0 }
  0x81   :  { %1404 = vmatpush3.bf16.msra.mxu1 %v1636_v20 }
  0x82   :  { %1405 = vmatprep.subr.bf16.mxu1 %v1771_v0 }
  0x83   :  { %1330 = vmatmul.mubr.bf16.gmra.mrb[12].mxu0 %v1615_v21  ;;  %1370 = vmatmul.mubr.bf16.gmra.mrb[12].mxu1 %v1625_v22 }
  0x84   :  { %1333 = vmatprep.mubr.msk.bf16.mxu0 %vm1772_vm0, %v1771_v0  ;;  %1373 = vmatprep.mubr.msk.bf16.mxu1 %vm1772_vm0, %v1771_v0 }
  0x85   :  { %1406 = vmatpush3.bf16.msra.mxu1 %v1637_v23 }
  0x86   :  { %1407 = vmatprep.subr.bf16.mxu1 %v1771_v0 }
  0x89   :  { %1408 = vmatpush3.bf16.msra.mxu1 %v1638_v35  ;;  %v1640_v35 = vld [vmem:[#allocation8 + $0x8] sm:$0xff]  }
  0x8a   :  { %1488 = vmatpush3.bf16.msra.mxu0 %v1640_v35 }
  0x8b   :  { %1334 = vmatmul.mubr.bf16.gmra.mrb[16].mxu0 %v1616_v24  ;;  %1374 = vmatmul.mubr.bf16.gmra.mrb[16].mxu1 %v1626_v25 }
  0x8c   :  { %1337 = vmatprep.mubr.msk.bf16.mxu0 %vm1772_vm0, %v1771_v0  ;;  %1377 = vmatprep.mubr.msk.bf16.mxu1 %vm1772_vm0, %v1771_v0 }
  0x8d   :  { %1489 = vmatprep.subr.bf16.mxu0 %v1771_v0 }
  0x93   :  { %1338 = vmatmul.mubr.bf16.gmra.mrb[20].mxu0 %v1617_v26  ;;  %1378 = vmatmul.mubr.bf16.gmra.mrb[20].mxu1 %v1627_v27 }
  0x94   :  { %1341 = vmatprep.mubr.msk.bf16.mxu0 %vm1772_vm0, %v1771_v0  ;;  %1381 = vmatprep.mubr.msk.bf16.mxu1 %vm1772_vm0, %v1771_v0 }
  0x9b   :  { %1342 = vmatmul.mubr.bf16.gmra.mrb[24].mxu0 %v1618_v28  ;;  %1382 = vmatmul.mubr.bf16.gmra.mrb[24].mxu1 %v1628_v29 }
  0x9c   :  { %1345 = vmatprep.mubr.msk.bf16.mxu0 %vm1772_vm0, %v1771_v0  ;;  %1385 = vmatprep.mubr.msk.bf16.mxu1 %vm1772_vm0, %v1771_v0 }
  0xa3   :  { %1346 = vmatmul.mubr.bf16.gmra.mrb[28].mxu0 %v1619_v30  ;;  %1386 = vmatmul.mubr.bf16.gmra.mrb[28].mxu1 %v1629_v31 }
  0xa4   :  { %1349 = vmatprep.mubr.msk.bf16.mxu0 %vm1772_vm0, %v1771_v0  ;;  %1389 = vmatprep.mubr.msk.bf16.mxu1 %vm1772_vm0, %v1771_v0 }
  0xab   :  { %1350 = vmatmul.mubr.bf16.gmra.mrb[32].mxu0 %v1620_v32  ;;  %1390 = vmatmul.mubr.bf16.gmra.mrb[32].mxu1 %v1630_v33 }
  0xac   :  { %1353 = vmatprep.mubr.msk.bf16.mxu0 %vm1772_vm0, %v1771_v0  ;;  %1409 = vmatprep.mubr.msk.bf16.mxu1 %vm1772_vm0, %v1771_v0 }
  0xb3   :  { %1354 = vmatmul.mubr.bf16.gmra.mrb[36].mxu0 %v1621_v34 }
  0xb4   :  { %1501 = vmatprep.mubr.msk.bf16.mxu0 %vm1772_vm0, %v1771_v0 }
 0x13e   :  { %v340_v37 = vpop.f32.mrb[0].mxu0  ;;  %v420_v38 = vpop.f32.mrb[0].mxu1 }
 0x13f   :  { %v341_v39 = vadd.f32 %v1960_v36, %v340_v37  ;;  %v1319_v40 = vpop.f32.mrb[1].mxu0  ;;  %v421_v41 = vadd.f32 %v1960_v36, %v420_v38  ;;  %v1359_v42 = vpop.f32.mrb[1].mxu1 }
 0x140   :  { %v343_v43 = vpop.f32.mrb[2].mxu0  ;;  %v423_v44 = vpop.f32.mrb[2].mxu1 }
 0x141   :  { %v344_v45 = vadd.f32 %v1960_v36, %v343_v43  ;;  %v1320_v46 = vpop.f32.mrb[3].mxu0  ;;  %v511_v47 = vmax.f32 %v421_v41, 0.0  ;;  %v424_v48 = vadd.f32 %v1960_v36, %v423_v44  ;;  %v1360_v49 = vpop.f32.mrb[3].mxu1  ;;  %v491_v50 = vmax.f32 %v341_v39, 0.0  ;;  %v1641_v44 = vld [vmem:[#allocation8 + $0x10] sm:$0xff]  }
 0x142   :  { %1490 = vmatpush3.bf16.msra.mxu0 %v1641_v44 }
 0x143   :  { %v492_v51 = vmax.f32 %v344_v45, 0.0  ;;  %v512_v52 = vmax.f32 %v424_v48, 0.0  ;;  %1491 = vmatprep.subr.bf16.mxu0 %v1771_v0 }
 0x145   :  { %v529_v53 = vpack.c.bf16 %v492_v51, %v491_v50  ;;  %v1966_v54 = vpack.c.bf16 %v512_v52, %v511_v47  ;;  %v1642_v50 = vld [vmem:[#allocation8 + $0x18] sm:$0xff]  }
 0x146   :  { %v348_v55 = vpop.f32.mrb[4].mxu0  ;;  %v428_v56 = vpop.f32.mrb[4].mxu1  ;;  %1492 = vmatpush3.bf16.msra.mxu0 %v1642_v50 }
 0x147   :  { %v349_v57 = vadd.f32 %v1960_v36, %v348_v55  ;;  %v1323_v58 = vpop.f32.mrb[5].mxu0  ;;  %1410 = vmatmul.mubr.bf16.vlgmr.msra.gmra.mrb[36].mxu1 %v529_v53  ;;  %v429_v59 = vadd.f32 %v1960_v36, %v428_v56  ;;  %v1363_v60 = vpop.f32.mrb[5].mxu1  ;;  %1493 = vmatprep.subr.bf16.mxu0 %v1771_v0 }
 0x148   :  { %v351_v61 = vpop.f32.mrb[6].mxu0  ;;  %1413 = vmatprep.mubr.msk.bf16.mxu1 %vm1772_vm0, %v1771_v0  ;;  %v431_v62 = vpop.f32.mrb[6].mxu1 }
 0x149   :  { %v352_v63 = vadd.f32 %v1960_v36, %v351_v61  ;;  %v1324_v1 = vpop.f32.mrb[7].mxu0  ;;  %v513_v2 = vmax.f32 %v429_v59, 0.0  ;;  %v432_v3 = vadd.f32 %v1960_v36, %v431_v62  ;;  %v1364_v4 = vpop.f32.mrb[7].mxu1  ;;  %v493_v5 = vmax.f32 %v349_v57, 0.0 }
 0x14b   :  { %v494_v6 = vmax.f32 %v352_v63, 0.0  ;;  %v514_v7 = vmax.f32 %v432_v3, 0.0 }
 0x14d   :  { %v530_v8 = vpack.c.bf16 %v494_v6, %v493_v5  ;;  %v1974_v9 = vpack.c.bf16 %v514_v7, %v513_v2  ;;  %v1643_v2 = vld [vmem:[#allocation8 + $0x20] sm:$0xff]  }
 0x14e   :  { %v356_v10 = vpop.f32.mrb[8].mxu0  ;;  %v436_v11 = vpop.f32.mrb[8].mxu1  ;;  %1494 = vmatpush3.bf16.msra.mxu0 %v1643_v2 }
 0x14f   :  { %v357_v12 = vadd.f32 %v1960_v36, %v356_v10  ;;  %v1327_v13 = vpop.f32.mrb[9].mxu0  ;;  %1414 = vmatmul.mubr.bf16.gmra.mrb[40].mxu1 %v530_v8  ;;  %v437_v14 = vadd.f32 %v1960_v36, %v436_v11  ;;  %v1367_v15 = vpop.f32.mrb[9].mxu1  ;;  %v1644_v8 = vld [vmem:[#allocation8 + $0x28] sm:$0xff]   ;;  %1495 = vmatprep.subr.bf16.mxu0 %v1771_v0 }
 0x150   :  { %v359_v17 = vpop.f32.mrb[10].mxu0  ;;  %1417 = vmatprep.mubr.msk.bf16.mxu1 %vm1772_vm0, %v1771_v0  ;;  %v439_v18 = vpop.f32.mrb[10].mxu1 }
 0x151   :  { %v360_v19 = vadd.f32 %v1960_v36, %v359_v17  ;;  %v1328_v20 = vpop.f32.mrb[11].mxu0  ;;  %v515_v21 = vmax.f32 %v437_v14, 0.0  ;;  %v440_v22 = vadd.f32 %v1960_v36, %v439_v18  ;;  %v1368_v23 = vpop.f32.mrb[11].mxu1  ;;  %v495_v24 = vmax.f32 %v357_v12, 0.0 }
 0x152   :  { %1496 = vmatpush3.bf16.msra.mxu0 %v1644_v8  ;;  %v1645_v23 = vld [vmem:[#allocation8 + $0x30] sm:$0xff]  }
 0x153   :  { %v496_v25 = vmax.f32 %v360_v19, 0.0  ;;  %v516_v26 = vmax.f32 %v440_v22, 0.0  ;;  %1497 = vmatprep.subr.bf16.mxu0 %v1771_v0 }
 0x155   :  { %v531_v27 = vpack.c.bf16 %v496_v25, %v495_v24  ;;  %v1983_v28 = vpack.c.bf16 %v516_v26, %v515_v21 }
 0x156   :  { %v364_v29 = vpop.f32.mrb[12].mxu0  ;;  %v444_v30 = vpop.f32.mrb[12].mxu1  ;;  %1498 = vmatpush3.bf16.msra.mxu0 %v1645_v23 }
 0x157   :  { %v365_v31 = vadd.f32 %v1960_v36, %v364_v29  ;;  %v1331_v32 = vpop.f32.mrb[13].mxu0  ;;  %1418 = vmatmul.mubr.bf16.gmra.mrb[44].mxu1 %v531_v27  ;;  %v445_v33 = vadd.f32 %v1960_v36, %v444_v30  ;;  %v1371_v34 = vpop.f32.mrb[13].mxu1  ;;  %v1646_v30 = vld [vmem:[#allocation8 + $0x38] sm:$0xff]   ;;  %1499 = vmatprep.subr.bf16.mxu0 %v1771_v0 }
 0x158   :  { %v367_v37 = vpop.f32.mrb[14].mxu0  ;;  %1421 = vmatprep.mubr.msk.bf16.mxu1 %vm1772_vm0, %v1771_v0  ;;  %v447_v38 = vpop.f32.mrb[14].mxu1 }
 0x159   :  { %v368_v39 = vadd.f32 %v1960_v36, %v367_v37  ;;  %v1332_v40 = vpop.f32.mrb[15].mxu0  ;;  %v517_v41 = vmax.f32 %v445_v33, 0.0  ;;  %v448_v42 = vadd.f32 %v1960_v36, %v447_v38  ;;  %v1372_v43 = vpop.f32.mrb[15].mxu1  ;;  %v497_v45 = vmax.f32 %v365_v31, 0.0 }
 0x15a   :  { %1500 = vmatpush3.bf16.msra.mxu0 %v1646_v30 }
 0x15b   :  { %v498_v46 = vmax.f32 %v368_v39, 0.0  ;;  %v518_v47 = vmax.f32 %v448_v42, 0.0 }
 0x15d   :  { %v532_v48 = vpack.c.bf16 %v498_v46, %v497_v45  ;;  %v1992_v49 = vpack.c.bf16 %v518_v47, %v517_v41 }
 0x15e   :  { %v372_v51 = vpop.f32.mrb[16].mxu0  ;;  %v452_v52 = vpop.f32.mrb[16].mxu1 }
 0x15f   :  { %v373_v53 = vadd.f32 %v1960_v36, %v372_v51  ;;  %v1335_v55 = vpop.f32.mrb[17].mxu0  ;;  %1422 = vmatmul.mubr.bf16.gmra.mrb[48].mxu1 %v532_v48  ;;  %v453_v56 = vadd.f32 %v1960_v36, %v452_v52  ;;  %v1375_v57 = vpop.f32.mrb[17].mxu1 }
 0x160   :  { %v375_v58 = vpop.f32.mrb[18].mxu0  ;;  %1425 = vmatprep.mubr.msk.bf16.mxu1 %vm1772_vm0, %v1771_v0  ;;  %v455_v59 = vpop.f32.mrb[18].mxu1 }
 0x161   :  { %v376_v60 = vadd.f32 %v1960_v36, %v375_v58  ;;  %v1336_v61 = vpop.f32.mrb[19].mxu0  ;;  %v519_v62 = vmax.f32 %v453_v56, 0.0  ;;  %v456_v63 = vadd.f32 %v1960_v36, %v455_v59  ;;  %v1376_v1 = vpop.f32.mrb[19].mxu1  ;;  %v499_v3 = vmax.f32 %v373_v53, 0.0 }
 0x163   :  { %v500_v4 = vmax.f32 %v376_v60, 0.0  ;;  %v520_v5 = vmax.f32 %v456_v63, 0.0 }
 0x165   :  { %v533_v6 = vpack.c.bf16 %v500_v4, %v499_v3  ;;  %v2002_v7 = vpack.c.bf16 %v520_v5, %v519_v62 }
 0x166   :  { %v380_v10 = vpop.f32.mrb[20].mxu0  ;;  %v460_v11 = vpop.f32.mrb[20].mxu1 }
 0x167   :  { %v381_v12 = vadd.f32 %v1960_v36, %v380_v10  ;;  %v1339_v13 = vpop.f32.mrb[21].mxu0  ;;  %1426 = vmatmul.mubr.bf16.gmra.mrb[52].mxu1 %v533_v6  ;;  %v461_v14 = vadd.f32 %v1960_v36, %v460_v11  ;;  %v1379_v15 = vpop.f32.mrb[21].mxu1 }
 0x168   :  { %v383_v16 = vpop.f32.mrb[22].mxu0  ;;  %1429 = vmatprep.mubr.msk.bf16.mxu1 %vm1772_vm0, %v1771_v0  ;;  %v463_v17 = vpop.f32.mrb[22].mxu1 }
 0x169   :  { %v384_v18 = vadd.f32 %v1960_v36, %v383_v16  ;;  %v1340_v19 = vpop.f32.mrb[23].mxu0  ;;  %v521_v20 = vmax.f32 %v461_v14, 0.0  ;;  %v464_v21 = vadd.f32 %v1960_v36, %v463_v17  ;;  %v1380_v22 = vpop.f32.mrb[23].mxu1  ;;  %v501_v24 = vmax.f32 %v381_v12, 0.0 }
 0x16b   :  { %v502_v25 = vmax.f32 %v384_v18, 0.0  ;;  %v522_v26 = vmax.f32 %v464_v21, 0.0 }
 0x16d   :  { %v534_v27 = vpack.c.bf16 %v502_v25, %v501_v24  ;;  %v2012_v29 = vpack.c.bf16 %v522_v26, %v521_v20 }
 0x16e   :  { %v388_v31 = vpop.f32.mrb[24].mxu0  ;;  %v468_v32 = vpop.f32.mrb[24].mxu1 }
 0x16f   :  { %v389_v33 = vadd.f32 %v1960_v36, %v388_v31  ;;  %v1343_v34 = vpop.f32.mrb[25].mxu0  ;;  %1430 = vmatmul.mubr.bf16.gmra.mrb[56].mxu1 %v534_v27  ;;  %v469_v35 = vadd.f32 %v1960_v36, %v468_v32  ;;  %v1383_v37 = vpop.f32.mrb[25].mxu1 }
 0x170   :  { %v391_v38 = vpop.f32.mrb[26].mxu0  ;;  %1433 = vmatprep.mubr.msk.bf16.mxu1 %vm1772_vm0, %v1771_v0  ;;  %v471_v39 = vpop.f32.mrb[26].mxu1 }
 0x171   :  { %v392_v40 = vadd.f32 %v1960_v36, %v391_v38  ;;  %v1344_v41 = vpop.f32.mrb[27].mxu0  ;;  %v523_v42 = vmax.f32 %v469_v35, 0.0  ;;  %v472_v43 = vadd.f32 %v1960_v36, %v471_v39  ;;  %v1384_v44 = vpop.f32.mrb[27].mxu1  ;;  %v503_v45 = vmax.f32 %v389_v33, 0.0 }
 0x173   :  { %v504_v46 = vmax.f32 %v392_v40, 0.0  ;;  %v524_v47 = vmax.f32 %v472_v43, 0.0 }
 0x175   :  { %v535_v48 = vpack.c.bf16 %v504_v46, %v503_v45  ;;  %v2021_v50 = vpack.c.bf16 %v524_v47, %v523_v42 }
 0x176   :  { %v396_v51 = vpop.f32.mrb[28].mxu0  ;;  %v476_v52 = vpop.f32.mrb[28].mxu1 }
 0x177   :  { %v397_v53 = vadd.f32 %v1960_v36, %v396_v51  ;;  %v1347_v55 = vpop.f32.mrb[29].mxu0  ;;  %1434 = vmatmul.mubr.bf16.gmra.mrb[60].mxu1 %v535_v48  ;;  %v477_v56 = vadd.f32 %v1960_v36, %v476_v52  ;;  %v1387_v57 = vpop.f32.mrb[29].mxu1 }
 0x178   :  { %v399_v58 = vpop.f32.mrb[30].mxu0  ;;  %1437 = vmatprep.mubr.msk.bf16.mxu1 %vm1772_vm0, %v1771_v0  ;;  %v479_v59 = vpop.f32.mrb[30].mxu1 }
 0x179   :  { %v400_v60 = vadd.f32 %v1960_v36, %v399_v58  ;;  %v1348_v61 = vpop.f32.mrb[31].mxu0  ;;  %v525_v62 = vmax.f32 %v477_v56, 0.0  ;;  %v480_v63 = vadd.f32 %v1960_v36, %v479_v59  ;;  %v1388_v1 = vpop.f32.mrb[31].mxu1  ;;  %v505_v2 = vmax.f32 %v397_v53, 0.0 }
 0x17b   :  { %v506_v3 = vmax.f32 %v400_v60, 0.0  ;;  %v526_v4 = vmax.f32 %v480_v63, 0.0 }
 0x17d   :  { %v536_v5 = vpack.c.bf16 %v506_v3, %v505_v2  ;;  %v546_v6 = vpack.c.bf16 %v526_v4, %v525_v62 }
 0x17e   :  { %v404_v8 = vpop.f32.mrb[32].mxu0  ;;  %v484_v10 = vpop.f32.mrb[32].mxu1 }
 0x17f   :  { %v405_v11 = vadd.f32 %v1960_v36, %v404_v8  ;;  %v1351_v12 = vpop.f32.mrb[33].mxu0  ;;  %1438 = vmatmul.mubr.bf16.gmra.mrb[64].mxu1 %v536_v5  ;;  %v485_v13 = vadd.f32 %v1960_v36, %v484_v10  ;;  %v1391_v14 = vpop.f32.mrb[33].mxu1 }
 0x180   :  { %v407_v15 = vpop.f32.mrb[34].mxu0  ;;  %1441 = vmatprep.mubr.msk.bf16.mxu1 %vm1772_vm0, %v1771_v0  ;;  %v487_v16 = vpop.f32.mrb[34].mxu1 }
 0x181   :  { %v408_v17 = vadd.f32 %v1960_v36, %v407_v15  ;;  %v1352_v18 = vpop.f32.mrb[35].mxu0  ;;  %v527_v19 = vmax.f32 %v485_v13, 0.0  ;;  %v488_v20 = vadd.f32 %v1960_v36, %v487_v16  ;;  %v1392_v21 = vpop.f32.mrb[35].mxu1  ;;  %v507_v22 = vmax.f32 %v405_v11, 0.0 }
 0x183   :  { %v508_v23 = vmax.f32 %v408_v17, 0.0  ;;  %v528_v24 = vmax.f32 %v488_v20, 0.0 }
 0x185   :  { %v537_v25 = vpack.c.bf16 %v508_v23, %v507_v22  ;;  %v547_v26 = vpack.c.bf16 %v528_v24, %v527_v19 }
 0x186   :  { %v412_v27 = vpop.f32.mrb[36].mxu0 }
 0x187   :  { %v413_v30 = vadd.f32 %v1960_v36, %v412_v27  ;;  %v1355_v31 = vpop.f32.mrb[37].mxu0  ;;  %1442 = vmatmul.mubr.bf16.gmra.mrb[68].mxu1 %v537_v25 }
 0x188   :  { %v415_v32 = vpop.f32.mrb[38].mxu0  ;;  %1445 = vmatprep.mubr.msk.bf16.mxu1 %vm1772_vm0, %v1771_v0 }
 0x189   :  { %v416_v33 = vadd.f32 %v1960_v36, %v415_v32  ;;  %v1356_v34 = vpop.f32.mrb[39].mxu0  ;;  %v509_v35 = vmax.f32 %v413_v30, 0.0  ;;  %v2067_v36 = vld [vmem:[%s2203_s5] ss:$0 sm:$0xff] }
 0x18b   :  { %v510_v37 = vmax.f32 %v416_v33, 0.0 }
 0x18d   :  { %v538_v38 = vpack.c.bf16 %v510_v37, %v509_v35 }
 0x18f   :  { %1446 = vmatmul.mubr.bf16.gmra.mrb[72].mxu1 %v538_v38 }
 0x190   :  { %1449 = vmatprep.mubr.msk.bf16.mxu1 %vm1772_vm0, %v1771_v0 }
 0x197   :  { %1450 = vmatmul.mubr.bf16.gmra.mrb[76].mxu1 %v1966_v54 }
 0x198   :  { %1453 = vmatprep.mubr.msk.bf16.mxu1 %vm1772_vm0, %v1771_v0 }
 0x19f   :  { %1454 = vmatmul.mubr.bf16.gmra.mrb[80].mxu1 %v1974_v9 }
 0x1a0   :  { %1457 = vmatprep.mubr.msk.bf16.mxu1 %vm1772_vm0, %v1771_v0 }
 0x1a7   :  { %1458 = vmatmul.mubr.bf16.gmra.mrb[84].mxu1 %v1983_v28 }
 0x1a8   :  { %1461 = vmatprep.mubr.msk.bf16.mxu1 %vm1772_vm0, %v1771_v0 }
 0x1af   :  { %1462 = vmatmul.mubr.bf16.gmra.mrb[88].mxu1 %v1992_v49 }
 0x1b0   :  { %1465 = vmatprep.mubr.msk.bf16.mxu1 %vm1772_vm0, %v1771_v0 }
 0x1b7   :  { %1466 = vmatmul.mubr.bf16.gmra.mrb[92].mxu1 %v2002_v7 }
 0x1b8   :  { %1469 = vmatprep.mubr.msk.bf16.mxu1 %vm1772_vm0, %v1771_v0 }
 0x1bf   :  { %1470 = vmatmul.mubr.bf16.gmra.mrb[96].mxu1 %v2012_v29 }
 0x1c0   :  { %1473 = vmatprep.mubr.msk.bf16.mxu1 %vm1772_vm0, %v1771_v0 }
 0x1c7   :  { %1474 = vmatmul.mubr.bf16.gmra.mrb[100].mxu1 %v2021_v50 }
 0x1c8   :  { %1477 = vmatprep.mubr.msk.bf16.mxu1 %vm1772_vm0, %v1771_v0 }
 0x1cf   :  { %1478 = vmatmul.mubr.bf16.gmra.mrb[104].mxu1 %v546_v6 }
 0x1d0   :  { %1481 = vmatprep.mubr.msk.bf16.mxu1 %vm1772_vm0, %v1771_v0 }
 0x1d7   :  { %1482 = vmatmul.mubr.bf16.gmra.mrb[108].mxu1 %v547_v26 }
 0x21a   :  { %v653_v54 = vpop.f32.mrb[36].mxu1 }
 0x21b   :  { %v654_v9 = vadd.f32 %v2067_v36, %v653_v54  ;;  %v1411_v28 = vpop.f32.mrb[37].mxu1 }
 0x21c   :  { %v656_v49 = vpop.f32.mrb[38].mxu1 }
 0x21d   :  { %v657_v7 = vadd.f32 %v2067_v36, %v656_v49  ;;  %v1412_v29 = vpop.f32.mrb[39].mxu1  ;;  %v804_v39 = vmax.f32 %v654_v9, 0.0 }
 0x21f   :  { %v805_v40 = vmax.f32 %v657_v7, 0.0 }
 0x221   :  { %v842_v41 = vpack.c.bf16 %v805_v40, %v804_v39 }
 0x222   :  { %v661_v42 = vpop.f32.mrb[40].mxu1 }
 0x223   :  { %v662_v43 = vadd.f32 %v2067_v36, %v661_v42  ;;  %v1415_v44 = vpop.f32.mrb[41].mxu1  ;;  %1502 = vmatmul.mubr.bf16.vlgmr.msra.gmra.mrb[40].mxu0 %v842_v41 }
 0x224   :  { %v664_v45 = vpop.f32.mrb[42].mxu1  ;;  %1505 = vmatprep.mubr.msk.bf16.mxu0 %vm1772_vm0, %v1771_v0 }
 0x225   :  { %v665_v46 = vadd.f32 %v2067_v36, %v664_v45  ;;  %v1416_v47 = vpop.f32.mrb[43].mxu1  ;;  %v806_v48 = vmax.f32 %v662_v43, 0.0 }
 0x227   :  { %v807_v50 = vmax.f32 %v665_v46, 0.0 }
 0x229   :  { %v843_v51 = vpack.c.bf16 %v807_v50, %v806_v48 }
 0x22a   :  { %v669_v52 = vpop.f32.mrb[44].mxu1 }
 0x22b   :  { %v670_v53 = vadd.f32 %v2067_v36, %v669_v52  ;;  %v1419_v55 = vpop.f32.mrb[45].mxu1  ;;  %1506 = vmatmul.mubr.bf16.gmra.mrb[44].mxu0 %v843_v51 }
 0x22c   :  { %v672_v56 = vpop.f32.mrb[46].mxu1  ;;  %1509 = vmatprep.mubr.msk.bf16.mxu0 %vm1772_vm0, %v1771_v0 }
 0x22d   :  { %v673_v57 = vadd.f32 %v2067_v36, %v672_v56  ;;  %v1420_v58 = vpop.f32.mrb[47].mxu1  ;;  %v808_v59 = vmax.f32 %v670_v53, 0.0 }
 0x22f   :  { %v809_v60 = vmax.f32 %v673_v57, 0.0 }
 0x231   :  { %v844_v61 = vpack.c.bf16 %v809_v60, %v808_v59 }
 0x232   :  { %v677_v62 = vpop.f32.mrb[48].mxu1 }
 0x233   :  { %v678_v63 = vadd.f32 %v2067_v36, %v677_v62  ;;  %v1423_v1 = vpop.f32.mrb[49].mxu1  ;;  %1510 = vmatmul.mubr.bf16.gmra.mrb[48].mxu0 %v844_v61 }
 0x234   :  { %v680_v2 = vpop.f32.mrb[50].mxu1  ;;  %1513 = vmatprep.mubr.msk.bf16.mxu0 %vm1772_vm0, %v1771_v0 }
 0x235   :  { %v681_v3 = vadd.f32 %v2067_v36, %v680_v2  ;;  %v1424_v4 = vpop.f32.mrb[51].mxu1  ;;  %v810_v5 = vmax.f32 %v678_v63, 0.0 }
 0x237   :  { %v811_v6 = vmax.f32 %v681_v3, 0.0 }
 0x239   :  { %v845_v8 = vpack.c.bf16 %v811_v6, %v810_v5 }
 0x23a   :  { %v685_v10 = vpop.f32.mrb[52].mxu1 }
 0x23b   :  { %v686_v11 = vadd.f32 %v2067_v36, %v685_v10  ;;  %v1427_v12 = vpop.f32.mrb[53].mxu1  ;;  %1514 = vmatmul.mubr.bf16.gmra.mrb[52].mxu0 %v845_v8 }
 0x23c   :  { %v688_v13 = vpop.f32.mrb[54].mxu1  ;;  %1517 = vmatprep.mubr.msk.bf16.mxu0 %vm1772_vm0, %v1771_v0 }
 0x23d   :  { %v689_v14 = vadd.f32 %v2067_v36, %v688_v13  ;;  %v1428_v15 = vpop.f32.mrb[55].mxu1  ;;  %v812_v16 = vmax.f32 %v686_v11, 0.0 }
 0x23f   :  { %v813_v17 = vmax.f32 %v689_v14, 0.0 }
 0x241   :  { %v846_v18 = vpack.c.bf16 %v813_v17, %v812_v16 }
 0x242   :  { %v693_v19 = vpop.f32.mrb[56].mxu1 }
 0x243   :  { %v694_v20 = vadd.f32 %v2067_v36, %v693_v19  ;;  %v1431_v21 = vpop.f32.mrb[57].mxu1  ;;  %1518 = vmatmul.mubr.bf16.gmra.mrb[56].mxu0 %v846_v18 }
 0x244   :  { %v696_v22 = vpop.f32.mrb[58].mxu1  ;;  %1521 = vmatprep.mubr.msk.bf16.mxu0 %vm1772_vm0, %v1771_v0 }
 0x245   :  { %v697_v23 = vadd.f32 %v2067_v36, %v696_v22  ;;  %v1432_v24 = vpop.f32.mrb[59].mxu1  ;;  %v814_v25 = vmax.f32 %v694_v20, 0.0 }
 0x247   :  { %v815_v26 = vmax.f32 %v697_v23, 0.0 }
 0x249   :  { %v847_v27 = vpack.c.bf16 %v815_v26, %v814_v25 }
 0x24a   :  { %v701_v30 = vpop.f32.mrb[60].mxu1 }
 0x24b   :  { %v702_v31 = vadd.f32 %v2067_v36, %v701_v30  ;;  %v1435_v32 = vpop.f32.mrb[61].mxu1  ;;  %1522 = vmatmul.mubr.bf16.gmra.mrb[60].mxu0 %v847_v27 }
 0x24c   :  { %v704_v33 = vpop.f32.mrb[62].mxu1  ;;  %1525 = vmatprep.mubr.msk.bf16.mxu0 %vm1772_vm0, %v1771_v0 }
 0x24d   :  { %v705_v34 = vadd.f32 %v2067_v36, %v704_v33  ;;  %v1436_v35 = vpop.f32.mrb[63].mxu1  ;;  %v816_v37 = vmax.f32 %v702_v31, 0.0 }
 0x24f   :  { %v817_v38 = vmax.f32 %v705_v34, 0.0 }
 0x251   :  { %v848_v54 = vpack.c.bf16 %v817_v38, %v816_v37 }
 0x252   :  { %v709_v9 = vpop.f32.mrb[64].mxu1 }
 0x253   :  { %v710_v28 = vadd.f32 %v2067_v36, %v709_v9  ;;  %v1439_v49 = vpop.f32.mrb[65].mxu1  ;;  %1526 = vmatmul.mubr.bf16.gmra.mrb[64].mxu0 %v848_v54 }
 0x254   :  { %v712_v7 = vpop.f32.mrb[66].mxu1  ;;  %1529 = vmatprep.mubr.msk.bf16.mxu0 %vm1772_vm0, %v1771_v0 }
 0x255   :  { %v713_v29 = vadd.f32 %v2067_v36, %v712_v7  ;;  %v1440_v39 = vpop.f32.mrb[67].mxu1  ;;  %v818_v40 = vmax.f32 %v710_v28, 0.0 }
 0x257   :  { %v819_v41 = vmax.f32 %v713_v29, 0.0 }
 0x259   :  { %v849_v42 = vpack.c.bf16 %v819_v41, %v818_v40 }
 0x25a   :  { %v717_v43 = vpop.f32.mrb[68].mxu1 }
 0x25b   :  { %v718_v44 = vadd.f32 %v2067_v36, %v717_v43  ;;  %v1443_v45 = vpop.f32.mrb[69].mxu1  ;;  %1530 = vmatmul.mubr.bf16.gmra.mrb[68].mxu0 %v849_v42 }
 0x25c   :  { %v720_v46 = vpop.f32.mrb[70].mxu1  ;;  %1533 = vmatprep.mubr.msk.bf16.mxu0 %vm1772_vm0, %v1771_v0 }
 0x25d   :  { %v721_v47 = vadd.f32 %v2067_v36, %v720_v46  ;;  %v1444_v48 = vpop.f32.mrb[71].mxu1  ;;  %v820_v50 = vmax.f32 %v718_v44, 0.0 }
 0x25f   :  { %v821_v51 = vmax.f32 %v721_v47, 0.0 }
 0x261   :  { %v850_v52 = vpack.c.bf16 %v821_v51, %v820_v50 }
 0x262   :  { %v725_v53 = vpop.f32.mrb[72].mxu1 }
 0x263   :  { %v726_v55 = vadd.f32 %v2067_v36, %v725_v53  ;;  %v1447_v56 = vpop.f32.mrb[73].mxu1  ;;  %1534 = vmatmul.mubr.bf16.gmra.mrb[72].mxu0 %v850_v52 }
 0x264   :  { %v728_v57 = vpop.f32.mrb[74].mxu1  ;;  %1537 = vmatprep.mubr.msk.bf16.mxu0 %vm1772_vm0, %v1771_v0 }
 0x265   :  { %v729_v58 = vadd.f32 %v2067_v36, %v728_v57  ;;  %v1448_v59 = vpop.f32.mrb[75].mxu1  ;;  %v822_v60 = vmax.f32 %v726_v55, 0.0 }
 0x267   :  { %v823_v61 = vmax.f32 %v729_v58, 0.0 }
 0x269   :  { %v851_v62 = vpack.c.bf16 %v823_v61, %v822_v60 }
 0x26a   :  { %v733_v63 = vpop.f32.mrb[76].mxu1 }
 0x26b   :  { %v734_v1 = vadd.f32 %v2067_v36, %v733_v63  ;;  %v1451_v2 = vpop.f32.mrb[77].mxu1  ;;  %1538 = vmatmul.mubr.bf16.gmra.mrb[76].mxu0 %v851_v62 }
 0x26c   :  { %v736_v3 = vpop.f32.mrb[78].mxu1  ;;  %1541 = vmatprep.mubr.msk.bf16.mxu0 %vm1772_vm0, %v1771_v0 }
 0x26d   :  { %v737_v4 = vadd.f32 %v2067_v36, %v736_v3  ;;  %v1452_v5 = vpop.f32.mrb[79].mxu1  ;;  %v824_v6 = vmax.f32 %v734_v1, 0.0 }
 0x26f   :  { %v825_v8 = vmax.f32 %v737_v4, 0.0 }
 0x271   :  { %v852_v10 = vpack.c.bf16 %v825_v8, %v824_v6 }
 0x272   :  { %v741_v11 = vpop.f32.mrb[80].mxu1 }
 0x273   :  { %v742_v12 = vadd.f32 %v2067_v36, %v741_v11  ;;  %v1455_v13 = vpop.f32.mrb[81].mxu1  ;;  %1542 = vmatmul.mubr.bf16.gmra.mrb[80].mxu0 %v852_v10 }
 0x274   :  { %v744_v14 = vpop.f32.mrb[82].mxu1  ;;  %1545 = vmatprep.mubr.msk.bf16.mxu0 %vm1772_vm0, %v1771_v0 }
 0x275   :  { %v745_v15 = vadd.f32 %v2067_v36, %v744_v14  ;;  %v1456_v16 = vpop.f32.mrb[83].mxu1  ;;  %v826_v17 = vmax.f32 %v742_v12, 0.0 }
 0x277   :  { %v827_v18 = vmax.f32 %v745_v15, 0.0 }
 0x279   :  { %v853_v19 = vpack.c.bf16 %v827_v18, %v826_v17 }
 0x27a   :  { %v749_v20 = vpop.f32.mrb[84].mxu1 }
 0x27b   :  { %v750_v21 = vadd.f32 %v2067_v36, %v749_v20  ;;  %v1459_v22 = vpop.f32.mrb[85].mxu1  ;;  %1546 = vmatmul.mubr.bf16.gmra.mrb[84].mxu0 %v853_v19 }
 0x27c   :  { %v752_v23 = vpop.f32.mrb[86].mxu1  ;;  %1549 = vmatprep.mubr.msk.bf16.mxu0 %vm1772_vm0, %v1771_v0 }
 0x27d   :  { %v753_v24 = vadd.f32 %v2067_v36, %v752_v23  ;;  %v1460_v25 = vpop.f32.mrb[87].mxu1  ;;  %v828_v26 = vmax.f32 %v750_v21, 0.0  ;;  %v2146_v21 = vld [vmem:[%s2204_s6] ss:$0 sm:$0xff]  ;;  %s1773_s6 = smov [#allocation10]  }
 0x27e   :  { %s1160_s28 = sshll.u32 %s1773_s6, 4  ;;  %s1161_s28 = int_to_ptr.vmem [resolvable:$true] %s1160_s28 }
 0x27f   :  { %v829_v27 = vmax.f32 %v753_v24, 0.0  ;;  %s1735_s29 = scalar_lea.vmem %s1161_s28, 4864  ;;  %p1740_p5 = scmp.lt.s32.totalorder %s1161_s28, %s1161_s28 }
 0x280   :  { %p1736_p4 = scmp.ne.s32.totalorder %s1161_s28, %s1735_s29  ;;  %p1741_p6 = scmp.lt.s32.totalorder %s1735_s29, %s1735_s29 }
 0x281   :  { %v854_v30 = vpack.c.bf16 %v829_v27, %v828_v26 }
 0x282   :  { %v757_v31 = vpop.f32.mrb[88].mxu1  ;;  %p1742_p7 = por %p1741_p6, %p1740_p5 }
 0x283   :  { %v758_v32 = vadd.f32 %v2067_v36, %v757_v31  ;;  %v1463_v33 = vpop.f32.mrb[89].mxu1  ;;  %1550 = vmatmul.mubr.bf16.gmra.mrb[88].mxu0 %v854_v30 }
 0x284   :  { %v760_v34 = vpop.f32.mrb[90].mxu1  ;;  %1553 = vmatprep.mubr.msk.bf16.mxu0 %vm1772_vm0, %v1771_v0  ;;  %p1743_p8 = pnand %p1742_p7, %p1736_p4 }
 0x285   :  { %v761_v35 = vadd.f32 %v2067_v36, %v760_v34  ;;  %v1464_v37 = vpop.f32.mrb[91].mxu1  ;;  %v830_v38 = vmax.f32 %v758_v32, 0.0 }
 0x287   :  { %v831_v54 = vmax.f32 %v761_v35, 0.0 }
 0x289   :  { %v855_v9 = vpack.c.bf16 %v831_v54, %v830_v38 }
 0x28a   :  { %v765_v28 = vpop.f32.mrb[92].mxu1 }
 0x28b   :  { %v766_v49 = vadd.f32 %v2067_v36, %v765_v28  ;;  %v1467_v7 = vpop.f32.mrb[93].mxu1  ;;  %1554 = vmatmul.mubr.bf16.gmra.mrb[92].mxu0 %v855_v9 }
 0x28c   :  { %v768_v29 = vpop.f32.mrb[94].mxu1  ;;  %1557 = vmatprep.mubr.msk.bf16.mxu0 %vm1772_vm0, %v1771_v0 }
 0x28d   :  { %v769_v39 = vadd.f32 %v2067_v36, %v768_v29  ;;  %v1468_v40 = vpop.f32.mrb[95].mxu1  ;;  %v832_v41 = vmax.f32 %v766_v49, 0.0 }
 0x28f   :  { %v833_v42 = vmax.f32 %v769_v39, 0.0 }
 0x291   :  { %v856_v43 = vpack.c.bf16 %v833_v42, %v832_v41 }
 0x292   :  { %v773_v44 = vpop.f32.mrb[96].mxu1 }
 0x293   :  { %v774_v45 = vadd.f32 %v2067_v36, %v773_v44  ;;  %v1471_v46 = vpop.f32.mrb[97].mxu1  ;;  %1558 = vmatmul.mubr.bf16.gmra.mrb[96].mxu0 %v856_v43 }
 0x294   :  { %v776_v47 = vpop.f32.mrb[98].mxu1  ;;  %1561 = vmatprep.mubr.msk.bf16.mxu0 %vm1772_vm0, %v1771_v0 }
 0x295   :  { %v777_v48 = vadd.f32 %v2067_v36, %v776_v47  ;;  %v1472_v50 = vpop.f32.mrb[99].mxu1  ;;  %v834_v51 = vmax.f32 %v774_v45, 0.0 }
 0x297   :  { %v835_v52 = vmax.f32 %v777_v48, 0.0 }
 0x299   :  { %v857_v53 = vpack.c.bf16 %v835_v52, %v834_v51 }
 0x29a   :  { %v781_v55 = vpop.f32.mrb[100].mxu1 }
 0x29b   :  { %v782_v56 = vadd.f32 %v2067_v36, %v781_v55  ;;  %v1475_v57 = vpop.f32.mrb[101].mxu1  ;;  %1562 = vmatmul.mubr.bf16.gmra.mrb[100].mxu0 %v857_v53 }
 0x29c   :  { %v784_v58 = vpop.f32.mrb[102].mxu1  ;;  %1565 = vmatprep.mubr.msk.bf16.mxu0 %vm1772_vm0, %v1771_v0 }
 0x29d   :  { %v785_v59 = vadd.f32 %v2067_v36, %v784_v58  ;;  %v1476_v60 = vpop.f32.mrb[103].mxu1  ;;  %v836_v61 = vmax.f32 %v782_v56, 0.0 }
 0x29f   :  { %v837_v62 = vmax.f32 %v785_v59, 0.0 }
 0x2a1   :  { %v858_v63 = vpack.c.bf16 %v837_v62, %v836_v61 }
 0x2a2   :  { %v789_v1 = vpop.f32.mrb[104].mxu1 }
 0x2a3   :  { %v790_v2 = vadd.f32 %v2067_v36, %v789_v1  ;;  %v1479_v3 = vpop.f32.mrb[105].mxu1  ;;  %1566 = vmatmul.mubr.bf16.gmra.mrb[104].mxu0 %v858_v63 }
 0x2a4   :  { %v792_v4 = vpop.f32.mrb[106].mxu1  ;;  %1569 = vmatprep.mubr.msk.bf16.mxu0 %vm1772_vm0, %v1771_v0 }
 0x2a5   :  { %v793_v5 = vadd.f32 %v2067_v36, %v792_v4  ;;  %v1480_v6 = vpop.f32.mrb[107].mxu1  ;;  %v838_v8 = vmax.f32 %v790_v2, 0.0 }
 0x2a7   :  { %v839_v10 = vmax.f32 %v793_v5, 0.0 }
 0x2a9   :  { %v859_v11 = vpack.c.bf16 %v839_v10, %v838_v8 }
 0x2aa   :  { %v797_v12 = vpop.f32.mrb[108].mxu1 }
 0x2ab   :  { %v798_v13 = vadd.f32 %v2067_v36, %v797_v12  ;;  %v1483_v14 = vpop.f32.mrb[109].mxu1  ;;  %1570 = vmatmul.mubr.bf16.gmra.mrb[108].mxu0 %v859_v11 }
 0x2ac   :  { %v800_v15 = vpop.f32.mrb[110].mxu1  ;;  %1573 = vmatprep.mubr.msk.bf16.mxu0 %vm1772_vm0, %v1771_v0 }
 0x2ad   :  { %v801_v16 = vadd.f32 %v2067_v36, %v800_v15  ;;  %v1484_v17 = vpop.f32.mrb[111].mxu1  ;;  %v840_v18 = vmax.f32 %v798_v13, 0.0 }
 0x2af   :  { %v841_v19 = vmax.f32 %v801_v16, 0.0 }
 0x2b1   :  { %v860_v20 = vpack.c.bf16 %v841_v19, %v840_v18 }
 0x2b3   :  { %1574 = vmatmul.mubr.bf16.gmra.mrb[112].mxu0 %v860_v20 }
 0x2f6   :  { %v966_v22 = vpop.f32.mrb[40].mxu0 }
 0x2f7   :  { %v967_v23 = vadd.f32 %v2146_v21, %v966_v22  ;;  %v1503_v24 = vpop.f32.mrb[41].mxu0 }
 0x2f8   :  { %v969_v25 = vpop.f32.mrb[42].mxu0 }
 0x2f9   :  { %1117 = vst [vmem:[#allocation10] sm:$0xff] %v967_v23  ;;  %v970_v0 = vadd.f32 %v2146_v21, %v969_v25  ;;  %v1504_v26 = vpop.f32.mrb[43].mxu0 }
 0x2fb   :  { %1118 = vst [vmem:[#allocation10 + $0x8] sm:$0xff] %v970_v0 }
 0x2fe   :  { %v974_v36 = vpop.f32.mrb[44].mxu0 }
 0x2ff   :  { %v975_v27 = vadd.f32 %v2146_v21, %v974_v36  ;;  %v1507_v30 = vpop.f32.mrb[45].mxu0 }
 0x300   :  { %v977_v31 = vpop.f32.mrb[46].mxu0 }
 0x301   :  { %1119 = vst [vmem:[#allocation10 + $0x10] sm:$0xff] %v975_v27  ;;  %v978_v32 = vadd.f32 %v2146_v21, %v977_v31  ;;  %v1508_v33 = vpop.f32.mrb[47].mxu0 }
 0x303   :  { %1120 = vst [vmem:[#allocation10 + $0x18] sm:$0xff] %v978_v32 }
 0x306   :  { %v982_v34 = vpop.f32.mrb[48].mxu0 }
 0x307   :  { %v983_v35 = vadd.f32 %v2146_v21, %v982_v34  ;;  %v1511_v37 = vpop.f32.mrb[49].mxu0 }
 0x308   :  { %v985_v38 = vpop.f32.mrb[50].mxu0 }
 0x309   :  { %1121 = vst [vmem:[#allocation10 + $0x20] sm:$0xff] %v983_v35  ;;  %v986_v54 = vadd.f32 %v2146_v21, %v985_v38  ;;  %v1512_v9 = vpop.f32.mrb[51].mxu0 }
 0x30b   :  { %1122 = vst [vmem:[#allocation10 + $0x28] sm:$0xff] %v986_v54 }
 0x30e   :  { %v990_v28 = vpop.f32.mrb[52].mxu0 }
 0x30f   :  { %v991_v49 = vadd.f32 %v2146_v21, %v990_v28  ;;  %v1515_v7 = vpop.f32.mrb[53].mxu0 }
 0x310   :  { %v993_v29 = vpop.f32.mrb[54].mxu0 }
 0x311   :  { %1123 = vst [vmem:[#allocation10 + $0x30] sm:$0xff] %v991_v49  ;;  %v994_v39 = vadd.f32 %v2146_v21, %v993_v29  ;;  %v1516_v40 = vpop.f32.mrb[55].mxu0 }
 0x313   :  { %1124 = vst [vmem:[#allocation10 + $0x38] sm:$0xff] %v994_v39 }
 0x316   :  { %v998_v41 = vpop.f32.mrb[56].mxu0 }
 0x317   :  { %v999_v42 = vadd.f32 %v2146_v21, %v998_v41  ;;  %v1519_v43 = vpop.f32.mrb[57].mxu0 }
 0x318   :  { %v1001_v44 = vpop.f32.mrb[58].mxu0 }
 0x319   :  { %1125 = vst [vmem:[#allocation10 + $0x40] sm:$0xff] %v999_v42  ;;  %v1002_v45 = vadd.f32 %v2146_v21, %v1001_v44  ;;  %v1520_v46 = vpop.f32.mrb[59].mxu0 }
 0x31b   :  { %1126 = vst [vmem:[#allocation10 + $0x48] sm:$0xff] %v1002_v45 }
 0x31e   :  { %v1006_v47 = vpop.f32.mrb[60].mxu0 }
 0x31f   :  { %v1007_v48 = vadd.f32 %v2146_v21, %v1006_v47  ;;  %v1523_v50 = vpop.f32.mrb[61].mxu0 }
 0x320   :  { %v1009_v51 = vpop.f32.mrb[62].mxu0 }
 0x321   :  { %1127 = vst [vmem:[#allocation10 + $0x50] sm:$0xff] %v1007_v48  ;;  %v1010_v52 = vadd.f32 %v2146_v21, %v1009_v51  ;;  %v1524_v53 = vpop.f32.mrb[63].mxu0 }
 0x323   :  { %1128 = vst [vmem:[#allocation10 + $0x58] sm:$0xff] %v1010_v52 }
 0x326   :  { %v1014_v55 = vpop.f32.mrb[64].mxu0 }
 0x327   :  { %v1015_v56 = vadd.f32 %v2146_v21, %v1014_v55  ;;  %v1527_v57 = vpop.f32.mrb[65].mxu0 }
 0x328   :  { %v1017_v58 = vpop.f32.mrb[66].mxu0 }
 0x329   :  { %1129 = vst [vmem:[#allocation10 + $0x60] sm:$0xff] %v1015_v56  ;;  %v1018_v59 = vadd.f32 %v2146_v21, %v1017_v58  ;;  %v1528_v60 = vpop.f32.mrb[67].mxu0 }
 0x32b   :  { %1130 = vst [vmem:[#allocation10 + $0x68] sm:$0xff] %v1018_v59 }
 0x32e   :  { %v1022_v61 = vpop.f32.mrb[68].mxu0 }
 0x32f   :  { %v1023_v62 = vadd.f32 %v2146_v21, %v1022_v61  ;;  %v1531_v63 = vpop.f32.mrb[69].mxu0 }
 0x330   :  { %v1025_v1 = vpop.f32.mrb[70].mxu0 }
 0x331   :  { %1131 = vst [vmem:[#allocation10 + $0x70] sm:$0xff] %v1023_v62  ;;  %v1026_v2 = vadd.f32 %v2146_v21, %v1025_v1  ;;  %v1532_v3 = vpop.f32.mrb[71].mxu0 }
 0x333   :  { %1132 = vst [vmem:[#allocation10 + $0x78] sm:$0xff] %v1026_v2 }
 0x336   :  { %v1030_v4 = vpop.f32.mrb[72].mxu0 }
 0x337   :  { %v1031_v5 = vadd.f32 %v2146_v21, %v1030_v4  ;;  %v1535_v6 = vpop.f32.mrb[73].mxu0 }
 0x338   :  { %v1033_v8 = vpop.f32.mrb[74].mxu0 }
 0x339   :  { %1133 = vst [vmem:[#allocation10 + $0x80] sm:$0xff] %v1031_v5  ;;  %v1034_v10 = vadd.f32 %v2146_v21, %v1033_v8  ;;  %v1536_v11 = vpop.f32.mrb[75].mxu0 }
 0x33b   :  { %1134 = vst [vmem:[#allocation10 + $0x88] sm:$0xff] %v1034_v10 }
 0x33e   :  { %v1038_v12 = vpop.f32.mrb[76].mxu0 }
 0x33f   :  { %v1039_v13 = vadd.f32 %v2146_v21, %v1038_v12  ;;  %v1539_v14 = vpop.f32.mrb[77].mxu0 }
 0x340   :  { %v1041_v15 = vpop.f32.mrb[78].mxu0 }
 0x341   :  { %1135 = vst [vmem:[#allocation10 + $0x90] sm:$0xff] %v1039_v13  ;;  %v1042_v16 = vadd.f32 %v2146_v21, %v1041_v15  ;;  %v1540_v17 = vpop.f32.mrb[79].mxu0 }
 0x343   :  { %1136 = vst [vmem:[#allocation10 + $0x98] sm:$0xff] %v1042_v16 }
 0x346   :  { %v1046_v18 = vpop.f32.mrb[80].mxu0 }
 0x347   :  { %v1047_v19 = vadd.f32 %v2146_v21, %v1046_v18  ;;  %v1543_v20 = vpop.f32.mrb[81].mxu0 }
 0x348   :  { %v1049_v22 = vpop.f32.mrb[82].mxu0 }
 0x349   :  { %1137 = vst [vmem:[#allocation10 + $0xa0] sm:$0xff] %v1047_v19  ;;  %v1050_v23 = vadd.f32 %v2146_v21, %v1049_v22  ;;  %v1544_v24 = vpop.f32.mrb[83].mxu0 }
 0x34b   :  { %1138 = vst [vmem:[#allocation10 + $0xa8] sm:$0xff] %v1050_v23 }
 0x34e   :  { %v1054_v25 = vpop.f32.mrb[84].mxu0 }
 0x34f   :  { %v1055_v0 = vadd.f32 %v2146_v21, %v1054_v25  ;;  %v1547_v26 = vpop.f32.mrb[85].mxu0 }
 0x350   :  { %v1057_v36 = vpop.f32.mrb[86].mxu0 }
 0x351   :  { %1139 = vst [vmem:[#allocation10 + $0xb0] sm:$0xff] %v1055_v0  ;;  %v1058_v27 = vadd.f32 %v2146_v21, %v1057_v36  ;;  %v1548_v30 = vpop.f32.mrb[87].mxu0 }
 0x353   :  { %1140 = vst [vmem:[#allocation10 + $0xb8] sm:$0xff] %v1058_v27 }
 0x356   :  { %v1062_v31 = vpop.f32.mrb[88].mxu0 }
 0x357   :  { %v1063_v32 = vadd.f32 %v2146_v21, %v1062_v31  ;;  %v1551_v33 = vpop.f32.mrb[89].mxu0 }
 0x358   :  { %v1065_v34 = vpop.f32.mrb[90].mxu0 }
 0x359   :  { %1141 = vst [vmem:[#allocation10 + $0xc0] sm:$0xff] %v1063_v32  ;;  %v1066_v35 = vadd.f32 %v2146_v21, %v1065_v34  ;;  %v1552_v37 = vpop.f32.mrb[91].mxu0 }
 0x35b   :  { %1142 = vst [vmem:[#allocation10 + $0xc8] sm:$0xff] %v1066_v35 }
 0x35e   :  { %v1070_v38 = vpop.f32.mrb[92].mxu0 }
 0x35f   :  { %v1071_v54 = vadd.f32 %v2146_v21, %v1070_v38  ;;  %v1555_v9 = vpop.f32.mrb[93].mxu0 }
 0x360   :  { %v1073_v28 = vpop.f32.mrb[94].mxu0 }
 0x361   :  { %1143 = vst [vmem:[#allocation10 + $0xd0] sm:$0xff] %v1071_v54  ;;  %v1074_v49 = vadd.f32 %v2146_v21, %v1073_v28  ;;  %v1556_v7 = vpop.f32.mrb[95].mxu0 }
 0x363   :  { %1144 = vst [vmem:[#allocation10 + $0xd8] sm:$0xff] %v1074_v49 }
 0x366   :  { %v1078_v29 = vpop.f32.mrb[96].mxu0 }
 0x367   :  { %v1079_v39 = vadd.f32 %v2146_v21, %v1078_v29  ;;  %v1559_v40 = vpop.f32.mrb[97].mxu0 }
 0x368   :  { %v1081_v41 = vpop.f32.mrb[98].mxu0 }
 0x369   :  { %1145 = vst [vmem:[#allocation10 + $0xe0] sm:$0xff] %v1079_v39  ;;  %v1082_v42 = vadd.f32 %v2146_v21, %v1081_v41  ;;  %v1560_v43 = vpop.f32.mrb[99].mxu0 }
 0x36b   :  { %1146 = vst [vmem:[#allocation10 + $0xe8] sm:$0xff] %v1082_v42 }
 0x36e   :  { %v1086_v44 = vpop.f32.mrb[100].mxu0 }
 0x36f   :  { %v1087_v45 = vadd.f32 %v2146_v21, %v1086_v44  ;;  %v1563_v46 = vpop.f32.mrb[101].mxu0 }
 0x370   :  { %v1089_v47 = vpop.f32.mrb[102].mxu0 }
 0x371   :  { %1147 = vst [vmem:[#allocation10 + $0xf0] sm:$0xff] %v1087_v45  ;;  %v1090_v48 = vadd.f32 %v2146_v21, %v1089_v47  ;;  %v1564_v50 = vpop.f32.mrb[103].mxu0 }
 0x373   :  { %1148 = vst [vmem:[#allocation10 + $0xf8] sm:$0xff] %v1090_v48 }
 0x376   :  { %v1094_v51 = vpop.f32.mrb[104].mxu0 }
 0x377   :  { %v1095_v52 = vadd.f32 %v2146_v21, %v1094_v51  ;;  %v1567_v53 = vpop.f32.mrb[105].mxu0 }
 0x378   :  { %v1097_v55 = vpop.f32.mrb[106].mxu0 }
 0x379   :  { %1149 = vst [vmem:[#allocation10 + $0x100] sm:$0xff] %v1095_v52  ;;  %v1098_v56 = vadd.f32 %v2146_v21, %v1097_v55  ;;  %v1568_v57 = vpop.f32.mrb[107].mxu0 }
 0x37b   :  { %1150 = vst [vmem:[#allocation10 + $0x108] sm:$0xff] %v1098_v56 }
 0x37e   :  { %v1102_v58 = vpop.f32.mrb[108].mxu0 }
 0x37f   :  { %v1103_v59 = vadd.f32 %v2146_v21, %v1102_v58  ;;  %v1571_v60 = vpop.f32.mrb[109].mxu0 }
 0x380   :  { %v1105_v61 = vpop.f32.mrb[110].mxu0 }
 0x381   :  { %1151 = vst [vmem:[#allocation10 + $0x110] sm:$0xff] %v1103_v59  ;;  %v1106_v62 = vadd.f32 %v2146_v21, %v1105_v61  ;;  %v1572_v63 = vpop.f32.mrb[111].mxu0 }
 0x383   :  { %1152 = vst [vmem:[#allocation10 + $0x118] sm:$0xff] %v1106_v62 }
 0x386   :  { %v1110_v1 = vpop.f32.mrb[112].mxu0 }
 0x387   :  { %v1111_v2 = vadd.f32 %v2146_v21, %v1110_v1  ;;  %v1575_v3 = vpop.f32.mrb[113].mxu0 }
 0x388   :  { %v1113_v4 = vpop.f32.mrb[114].mxu0 }
 0x389   :  { %1153 = vst [vmem:[#allocation10 + $0x120] sm:$0xff] %v1111_v2  ;;  %v1114_v5 = vadd.f32 %v2146_v21, %v1113_v4  ;;  %v1576_v6 = vpop.f32.mrb[115].mxu0 }
 0x38b   :  { %1154 = vst [vmem:[#allocation10 + $0x128] sm:$0xff] %v1114_v5 }
 0x38c   :  { %1746 = shalt.err (!%p1743_p8)
}
 0x38d   :  { %s1747_s9 = scalar_lea.hbm %s2205_s7, 4864 }
 0x38e   :  { %p1748_p9 = scmp.ne.s32.totalorder %s2205_s7, %s1747_s9  ;;  %p1751_p10 = scmp.lt.u32.totalorder %s1747_s9, %s2205_s7 }
 0x390   :  { %p1753_p11 = pnand %p1751_p10, %p1748_p9 }
 0x392   :  { %1756 = shalt.err (!%p1753_p11)
}
 0x393   :  { %s1774_s16 = smov 128   ;;  %s1775_s0 = smov 8  }
 0x394   :  { %1166 = dma.vmem_to_hbm [thread:$0]  %s1161_s28, 4864, %s2205_s7, [#allocation4], %s1774_s16, %s1774_s16, %s1775_s0  }
 0x395   :  { %1763 = dma.done.wait [#allocation4], 4864  }
 0x396   :  { %1764 = vsyncadd [#allocation4], 4294962432 }
 0x397   :  { %1170 = vsyncpa [#allocation3], 1 }
 0x398   :  { %1171 = vsyncpa [#allocation6], 1 }
 0x399   :  { %1172 = vsyncpa [#allocation9], 1 }
 0x39a   :  { %1173 = vsyncpa [#allocation4], 1 }

</bundles_post_ra>
